<compile_context>
chip_gen: v7x
topology: tpu7x:2x2x1
jax: 0.10.0
libtpu: 0.0.40
codegen_flags: <defaults>
</compile_context>

<pallas_src>
import functools

import jax
import jax.numpy as jnp
from jax import lax
from jax.experimental import pallas as pl
from jax.experimental.pallas import tpu as pltpu

BN_EPS = 0.8          # nn.BatchNorm1d(hidden_size, 0.8): 2nd positional arg is eps
LANES = 128           # TPU lane width
IN_W = 128            # padded lane width of the packed activation input
BF16_TILE = 16        # bf16 sublane tile


def _round_up(x, m):
    return (x + m - 1) // m * m


def _batchnorm_train(h, gamma, beta, inv_b):
    """Training-mode BatchNorm1d (biased batch stats), overlapped reductions.

    s1 and s2 are independent so the two XLU cross-sublane reduces pipeline
    instead of serializing through mu.  var = E[h^2] - mu^2 is only safe here
    because BN_EPS = 0.8 swamps any cancellation error.
    """
    s1 = jnp.sum(h, axis=0, keepdims=True)
    s2 = jnp.sum(h * h, axis=0, keepdims=True)
    mu = s1 * inv_b
    var = s2 * inv_b - mu * mu
    scale = lax.rsqrt(var + BN_EPS) * gamma
    return (h - mu) * scale + beta


def _condvae_kernel(xin_ref, wenc_ref, wmid_ref, v_ref, out_ref, *,
                    latent_dim, xc_pad, pw, inv_b):
    xin = xin_ref[...]          # (B, IN_W)   f32 : [x | cond | pad | eps | pad]
    wenc = wenc_ref[...]        # (IN_W, 2pw) bf16: [w1e_pad | cond->dec-hidden]
    V = v_ref[...]              # (8, pw)     f32

    b1e, g1e, be1e = V[0:1], V[1:2], V[2:3]
    b1d, g1d, be1d = V[3:4], V[4:5], V[5:6]
    bias_out = V[6:7]           # fused [bme | ble | b2d | 0]
    mask = V[7:8]               # 1.0 on lanes [0, 2*latent_dim), else 0.0

    # --- encoder first layer; cond's contribution to the decoder hidden is
    #     folded into the same 256-lane MXU pass (lanes [pw, 2*pw)) ---
    pre = jnp.dot(xin.astype(wenc.dtype), wenc,
                  preferred_element_type=jnp.float32)
    h = jnp.tanh(pre[:, :pw] + b1e)
    cond_contrib = pre[:, pw:]
    h = _batchnorm_train(h, g1e, be1e, inv_b)

    # --- fused mean/logvar projection: one MXU pass, lanes [0,L) | [L,2L) ---
    w_out = wmid_ref[latent_dim:latent_dim + pw, :]
    proj_enc = jnp.dot(h.astype(w_out.dtype), w_out,
                       preferred_element_type=jnp.float32) + bias_out

    z_mean = proj_enc[:, :latent_dim]
    z_logvar = proj_enc[:, latent_dim:2 * latent_dim]

    # --- reparameterization ---
    eps = xin[:, xc_pad:xc_pad + latent_dim]
    noise = z_mean + jnp.exp(0.5 * z_logvar) * eps

    # --- decoder: concat(noise, cond) split -> noise @ W_z + cond_contrib ---
    w_dec = wmid_ref[0:latent_dim, :]
    hd = jnp.tanh(jnp.dot(noise.astype(w_dec.dtype), w_dec,
                          preferred_element_type=jnp.float32)
                  + cond_contrib + b1d)
    hd = _batchnorm_train(hd, g1d, be1d, inv_b)
    proj_dec = jnp.dot(hd.astype(w_out.dtype), w_out,
                       preferred_element_type=jnp.float32) + bias_out

    # --- single lane-dense store: [z_mean | z_logvar | x_tilda | 0...] ---
    out_ref[...] = proj_dec + mask * (proj_enc - proj_dec)


def condvae_forward(x, cond, eps, packed):
    """x: (G, B, n_input), cond: (G, B, 1), eps: (G, B, latent_dim).

    Each group g is one independent CondVAE.forward call (BatchNorm statistics
    are taken over that group's B rows).  The Pallas grid iterates over groups;
    weight slabs stay VMEM-resident across steps.
    """
    G, B, n_input = x.shape
    latent_dim = packed["latent_dim"]
    n_output = packed["n_output"]
    xc_pad = packed["xc_pad"]
    pw = packed["pw"]

    pad_a = xc_pad - (n_input + 1)
    pad_b = IN_W - (xc_pad + latent_dim)
    xin = jnp.concatenate(
        [x, cond,
         jnp.zeros((G, B, pad_a), jnp.float32),
         eps,
         jnp.zeros((G, B, pad_b), jnp.float32)], axis=-1)          # (G, B, 128)

    kernel = functools.partial(
        _condvae_kernel, latent_dim=latent_dim, xc_pad=xc_pad, pw=pw,
        inv_b=1.0 / B)

    const2 = lambda g: (0, 0)                  # weights: same block every step
    out = pl.pallas_call(
        kernel,
        out_shape=jax.ShapeDtypeStruct((G, B, pw), jnp.float32),
        grid=(G,),
        in_specs=[
            pl.BlockSpec((None, B, IN_W), lambda g: (g, 0, 0)),    # streams
            pl.BlockSpec((IN_W, 2 * pw), const2),                  # resident
            pl.BlockSpec((latent_dim + pw, pw), const2),           # resident
            pl.BlockSpec((8, pw), const2),                         # resident
        ],
        out_specs=pl.BlockSpec((None, B, pw), lambda g: (g, 0, 0)),
        compiler_params=pltpu.CompilerParams(
            dimension_semantics=("parallel",)),        # 2 TCs on v7x
    )(xin, packed["w_enc"], packed["w_mid"], packed["slab_v"])

    z_mean = out[..., :latent_dim]
    z_logvar = out[..., latent_dim:2 * latent_dim]
    x_tilda = out[..., 2 * latent_dim:2 * latent_dim + n_output]
    return z_mean, z_logvar, x_tilda


def init_params(key, n_input, n_output, latent_dim, hidden_size):
    """PyTorch-default Linear init for all CondVAE sub-modules (f32)."""
    def lin(k, fan_in, fan_out):
        bound = 1.0 / float(fan_in) ** 0.5
        kw, kb = jax.random.split(k)
        w = jax.random.uniform(kw, (fan_in, fan_out), jnp.float32, -bound, bound)
        b = jax.random.uniform(kb, (fan_out,), jnp.float32, -bound, bound)
        return w, b

    ks = jax.random.split(key, 5)
    w1e, b1e = lin(ks[0], n_input + 1, hidden_size)      # encoder Linear
    wme, bme = lin(ks[1], hidden_size, latent_dim)        # fc_mean
    wle, ble = lin(ks[2], hidden_size, latent_dim)        # fc_logvar
    w1d, b1d = lin(ks[3], latent_dim + 1, hidden_size)    # decoder Linear(concat)
    w2d, b2d = lin(ks[4], hidden_size, n_output)          # decoder output Linear
    ones = jnp.ones((hidden_size,), jnp.float32)
    zeros = jnp.zeros((hidden_size,), jnp.float32)
    return dict(w1e=w1e, b1e=b1e, wme=wme, bme=bme, wle=wle, ble=ble,
                w1d=w1d, b1d=b1d, w2d=w2d, b2d=b2d,
                g1e=ones, be1e=zeros, g1d=ones, be1d=zeros,
                n_input=n_input, n_output=n_output,
                latent_dim=latent_dim, hidden_size=hidden_size)


def pack_params(p):
    """Pack module params into lane-dense kernel slabs (bf16 matmul weights)."""
    n_input, n_output = p["n_input"], p["n_output"]
    latent_dim, hidden = p["latent_dim"], p["hidden_size"]
    xc_pad = _round_up(n_input + 1, BF16_TILE)
    pw = _round_up(max(hidden, 2 * latent_dim + n_output), LANES)
    assert xc_pad + latent_dim <= IN_W
    assert latent_dim % BF16_TILE == 0   # keeps w_mid / eps slices tile-aligned

    # w_enc (IN_W, 2*pw): lanes [0,pw) = encoder first Linear (rows beyond
    # n_input+1 are zero, so the eps/pad columns of xin contribute nothing);
    # lanes [pw,2*pw) = cond-row of the decoder first Linear so the cond
    # contribution to the decoder hidden comes out of the same MXU pass.
    w_enc = jnp.zeros((IN_W, 2 * pw), jnp.float32)
    w_enc = w_enc.at[:n_input + 1, :hidden].set(p["w1e"])
    w_enc = w_enc.at[n_input, pw:pw + hidden].set(p["w1d"][latent_dim, :])
    w_enc = w_enc.astype(jnp.bfloat16)

    # w_mid: [w1d(noise rows) ; fused W_out = [wme | wle | w2d | 0]]
    w_mid = jnp.zeros((latent_dim + pw, pw), jnp.float32)
    w_mid = w_mid.at[:latent_dim, :hidden].set(p["w1d"][:latent_dim, :])
    w_mid = w_mid.at[latent_dim:latent_dim + hidden, :latent_dim].set(p["wme"])
    w_mid = w_mid.at[latent_dim:latent_dim + hidden,
                     latent_dim:2 * latent_dim].set(p["wle"])
    w_mid = w_mid.at[latent_dim:latent_dim + hidden,
                     2 * latent_dim:2 * latent_dim + n_output].set(p["w2d"])
    w_mid = w_mid.astype(jnp.bfloat16)

    def row(v):
        return jnp.zeros((pw,), jnp.float32).at[:v.shape[0]].set(v)

    bias_out = jnp.zeros((pw,), jnp.float32)
    bias_out = bias_out.at[:latent_dim].set(p["bme"])
    bias_out = bias_out.at[latent_dim:2 * latent_dim].set(p["ble"])
    bias_out = bias_out.at[2 * latent_dim:2 * latent_dim + n_output].set(p["b2d"])
    mask = (jnp.arange(pw) < 2 * latent_dim).astype(jnp.float32)

    slab_v = jnp.stack(
        [row(p["b1e"]), row(p["g1e"]), row(p["be1e"]),
         row(p["b1d"]), row(p["g1d"]), row(p["be1d"]),
         bias_out, mask], axis=0)

    return dict(w_enc=w_enc, w_mid=w_mid, slab_v=slab_v,
                n_input=n_input, n_output=n_output,
                latent_dim=latent_dim, hidden_size=hidden,
                xc_pad=xc_pad, pw=pw)


# ---------------- pure-JAX f32 reference (per group) ----------------
def _bn_ref(h, gamma, beta):
    mu = jnp.mean(h, axis=0, keepdims=True)
    var = jnp.mean((h - mu) ** 2, axis=0, keepdims=True)
    return (h - mu) / jnp.sqrt(var + BN_EPS) * gamma + beta


def condvae_reference(p, x, cond, eps):
    xc = jnp.concatenate([x, cond], axis=1)
    h = _bn_ref(jnp.tanh(xc @ p["w1e"] + p["b1e"]), p["g1e"], p["be1e"])
    z_mean = h @ p["wme"] + p["bme"]
    z_logvar = h @ p["wle"] + p["ble"]
    noise = z_mean + jnp.exp(0.5 * z_logvar) * eps
    d_in = jnp.concatenate([noise, cond], axis=1)
    hd = _bn_ref(jnp.tanh(d_in @ p["w1d"] + p["b1d"]), p["g1d"], p["be1d"])
    x_tilda = hd @ p["w2d"] + p["b2d"]
    return z_mean, z_logvar, x_tilda


if __name__ == "__main__":
    G, B = 4, 128                      # 4 independent CondVAE batches, 128 rows each
    n_input, n_output = 4, 4
    latent_dim, hidden_size = 16, 64

    key = jax.random.PRNGKey(0)
    kx, kc, kp, ke = jax.random.split(key, 4)

    x = jax.random.normal(kx, (G, B, n_input), jnp.float32)
    cond = jax.random.normal(kc, (G, B, 1), jnp.float32)

    params = init_params(kp, n_input, n_output, latent_dim, hidden_size)
    packed = pack_params(params)

    # eps ~ Normal(mean=[-3]*(L//2)+[3]*(L//2), std=1), sampled in JAX glue to
    # mirror torch.normal in the reference forward.
    eps_mean = jnp.concatenate(
        [jnp.full((latent_dim // 2,), -3.0), jnp.full((latent_dim // 2,), 3.0)])
    eps = eps_mean + jax.random.normal(ke, (G, B, latent_dim), jnp.float32)

    fwd = jax.jit(functools.partial(condvae_forward, packed=packed))
    z_mean, z_logvar, x_tilda = fwd(x, cond, eps)
    jax.block_until_ready((z_mean, z_logvar, x_tilda))

    assert z_mean.shape == (G, B, latent_dim)
    assert z_logvar.shape == (G, B, latent_dim)
    assert x_tilda.shape == (G, B, n_output)
    assert bool(jnp.all(jnp.isfinite(z_mean)))
    assert bool(jnp.all(jnp.isfinite(z_logvar)))
    assert bool(jnp.all(jnp.isfinite(x_tilda)))

    # f32 reference check (bf16 MXU inputs -> ~1e-2 worst-case abs deviation).
    ref = jax.vmap(functools.partial(condvae_reference, params))
    zm_r, zl_r, xt_r = ref(x, cond, eps)
    for got, want in ((z_mean, zm_r), (z_logvar, zl_r), (x_tilda, xt_r)):
        err = float(jnp.max(jnp.abs(got - want)))
        assert err < 1e-1, f"max abs err {err}"

    print("KERNEL_OK")
</pallas_src>

<mosaic_0001>
module attributes {stable_mosaic.version = 11 : i64} {
  func.func @_condvae_kernel(%arg0: i32, %arg1: memref<1x128x128xf32, #tpu.memory_space<vmem>>, %arg2: memref<128x256xbf16, #tpu.memory_space<vmem>>, %arg3: memref<144x128xbf16, #tpu.memory_space<vmem>>, %arg4: memref<8x128xf32, #tpu.memory_space<vmem>>, %arg5: memref<1x128x128xf32, #tpu.memory_space<vmem>>) attributes {dimension_semantics = [#tpu.dimension_semantics<parallel>], iteration_bounds = array<i64: 4>, scalar_prefetch = 0 : i64, scratch_operands = 0 : i64, tpu.core_type = #tpu.core_type<tc>, window_params = [{transform_indices = @transform_0, window_bounds = array<i64: 1, 128, 128>}, {pipeline_mode = #tpu.pipeline_mode<synchronous>, transform_indices = @transform_1, window_bounds = array<i64: 128, 256>}, {pipeline_mode = #tpu.pipeline_mode<synchronous>, transform_indices = @transform_2, window_bounds = array<i64: 144, 128>}, {pipeline_mode = #tpu.pipeline_mode<synchronous>, transform_indices = @transform_3, window_bounds = array<i64: 8, 128>}, {transform_indices = @transform_4, window_bounds = array<i64: 1, 128, 128>}]} {
    %c0 = arith.constant 0 : index
    %c0_0 = arith.constant 0 : index
    %c0_1 = arith.constant 0 : index
    %0 = vector.load %arg1[%c0, %c0_0, %c0_1] : memref<1x128x128xf32, #tpu.memory_space<vmem>>, vector<1x128x128xf32>
    %1 = vector.shape_cast %0 : vector<1x128x128xf32> to vector<128x128xf32>
    %c0_2 = arith.constant 0 : index
    %c0_3 = arith.constant 0 : index
    %2 = vector.load %arg2[%c0_2, %c0_3] : memref<128x256xbf16, #tpu.memory_space<vmem>>, vector<128x256xbf16>
    %c0_4 = arith.constant 0 : index
    %c0_5 = arith.constant 0 : index
    %3 = vector.load %arg4[%c0_4, %c0_5] : memref<8x128xf32, #tpu.memory_space<vmem>>, vector<8x128xf32>
    %4 = vector.extract_strided_slice %3 {offsets = [0, 0], sizes = [1, 128], strides = [1, 1]} : vector<8x128xf32> to vector<1x128xf32>
    %5 = vector.extract_strided_slice %3 {offsets = [1, 0], sizes = [1, 128], strides = [1, 1]} : vector<8x128xf32> to vector<1x128xf32>
    %6 = vector.extract_strided_slice %3 {offsets = [2, 0], sizes = [1, 128], strides = [1, 1]} : vector<8x128xf32> to vector<1x128xf32>
    %7 = vector.extract_strided_slice %3 {offsets = [3, 0], sizes = [1, 128], strides = [1, 1]} : vector<8x128xf32> to vector<1x128xf32>
    %8 = vector.extract_strided_slice %3 {offsets = [4, 0], sizes = [1, 128], strides = [1, 1]} : vector<8x128xf32> to vector<1x128xf32>
    %9 = vector.extract_strided_slice %3 {offsets = [5, 0], sizes = [1, 128], strides = [1, 1]} : vector<8x128xf32> to vector<1x128xf32>
    %10 = vector.extract_strided_slice %3 {offsets = [6, 0], sizes = [1, 128], strides = [1, 1]} : vector<8x128xf32> to vector<1x128xf32>
    %11 = vector.extract_strided_slice %3 {offsets = [7, 0], sizes = [1, 128], strides = [1, 1]} : vector<8x128xf32> to vector<1x128xf32>
    %12 = arith.truncf %1 : vector<128x128xf32> to vector<128x128xbf16>
    %cst = arith.constant dense<0.000000e+00> : vector<128x256xf32>
    %13 = tpu.matmul %12, %2, %cst {dimension_numbers = #tpu.dot_dimension_numbers<[1], [0], [0], [1], [0, 0, 1, 1], [], []>} : vector<128x128xbf16>, vector<128x256xbf16>, vector<128x256xf32> -> vector<128x256xf32>
    %14 = vector.extract_strided_slice %13 {offsets = [0, 0], sizes = [128, 128], strides = [1, 1]} : vector<128x256xf32> to vector<128x128xf32>
    %15 = vector.broadcast %4 : vector<1x128xf32> to vector<128x128xf32>
    %16 = arith.addf %14, %15 : vector<128x128xf32>
    %17 = math.tanh %16 : vector<128x128xf32>
    %18 = vector.extract_strided_slice %13 {offsets = [0, 128], sizes = [128, 128], strides = [1, 1]} : vector<128x256xf32> to vector<128x128xf32>
    %cst_6 = arith.constant dense<0.000000e+00> : vector<128xf32>
    %19 = vector.multi_reduction <add>, %17, %cst_6 [0] : vector<128x128xf32> to vector<128xf32>
    %20 = vector.shape_cast %19 : vector<128xf32> to vector<1x128xf32>
    %21 = arith.mulf %17, %17 : vector<128x128xf32>
    %cst_7 = arith.constant dense<0.000000e+00> : vector<128xf32>
    %22 = vector.multi_reduction <add>, %21, %cst_7 [0] : vector<128x128xf32> to vector<128xf32>
    %23 = vector.shape_cast %22 : vector<128xf32> to vector<1x128xf32>
    %cst_8 = arith.constant 7.812500e-03 : f32
    %24 = vector.broadcast %cst_8 : f32 to vector<1x128xf32>
    %25 = arith.mulf %20, %24 : vector<1x128xf32>
    %cst_9 = arith.constant 7.812500e-03 : f32
    %26 = vector.broadcast %cst_9 : f32 to vector<1x128xf32>
    %27 = arith.mulf %23, %26 : vector<1x128xf32>
    %28 = arith.mulf %25, %25 : vector<1x128xf32>
    %29 = arith.subf %27, %28 : vector<1x128xf32>
    %cst_10 = arith.constant 8.000000e-01 : f32
    %30 = vector.broadcast %cst_10 : f32 to vector<1x128xf32>
    %31 = arith.addf %29, %30 : vector<1x128xf32>
    %32 = math.rsqrt %31 : vector<1x128xf32>
    %33 = arith.mulf %32, %5 : vector<1x128xf32>
    %34 = vector.broadcast %25 : vector<1x128xf32> to vector<128x128xf32>
    %35 = arith.subf %17, %34 : vector<128x128xf32>
    %36 = vector.broadcast %33 : vector<1x128xf32> to vector<128x128xf32>
    %37 = arith.mulf %35, %36 : vector<128x128xf32>
    %38 = vector.broadcast %6 : vector<1x128xf32> to vector<128x128xf32>
    %39 = arith.addf %37, %38 : vector<128x128xf32>
    %c16 = arith.constant 16 : index
    %c0_11 = arith.constant 0 : index
    %40 = vector.load %arg3[%c16, %c0_11] : memref<144x128xbf16, #tpu.memory_space<vmem>>, vector<128x128xbf16>
    %41 = arith.truncf %39 : vector<128x128xf32> to vector<128x128xbf16>
    %cst_12 = arith.constant dense<0.000000e+00> : vector<128x128xf32>
    %42 = tpu.matmul %41, %40, %cst_12 {dimension_numbers = #tpu.dot_dimension_numbers<[1], [0], [0], [1], [0, 0, 1, 1], [], []>} : vector<128x128xbf16>, vector<128x128xbf16>, vector<128x128xf32> -> vector<128x128xf32>
    %43 = vector.broadcast %10 : vector<1x128xf32> to vector<128x128xf32>
    %44 = arith.addf %42, %43 : vector<128x128xf32>
    %45 = vector.extract_strided_slice %44 {offsets = [0, 0], sizes = [128, 16], strides = [1, 1]} : vector<128x128xf32> to vector<128x16xf32>
    %46 = vector.extract_strided_slice %44 {offsets = [0, 16], sizes = [128, 16], strides = [1, 1]} : vector<128x128xf32> to vector<128x16xf32>
    %47 = vector.extract_strided_slice %1 {offsets = [0, 16], sizes = [128, 16], strides = [1, 1]} : vector<128x128xf32> to vector<128x16xf32>
    %cst_13 = arith.constant 5.000000e-01 : f32
    %48 = vector.broadcast %cst_13 : f32 to vector<128x16xf32>
    %49 = arith.mulf %48, %46 : vector<128x16xf32>
    %50 = math.exp %49 : vector<128x16xf32>
    %51 = arith.mulf %50, %47 : vector<128x16xf32>
    %52 = arith.addf %45, %51 : vector<128x16xf32>
    %c0_14 = arith.constant 0 : index
    %c0_15 = arith.constant 0 : index
    %53 = vector.load %arg3[%c0_14, %c0_15] : memref<144x128xbf16, #tpu.memory_space<vmem>>, vector<16x128xbf16>
    %54 = arith.truncf %52 : vector<128x16xf32> to vector<128x16xbf16>
    %cst_16 = arith.constant dense<0.000000e+00> : vector<128x128xf32>
    %55 = tpu.matmul %54, %53, %cst_16 {dimension_numbers = #tpu.dot_dimension_numbers<[1], [0], [0], [1], [0, 0, 1, 1], [], []>} : vector<128x16xbf16>, vector<16x128xbf16>, vector<128x128xf32> -> vector<128x128xf32>
    %56 = arith.addf %55, %18 : vector<128x128xf32>
    %57 = vector.broadcast %7 : vector<1x128xf32> to vector<128x128xf32>
    %58 = arith.addf %56, %57 : vector<128x128xf32>
    %59 = math.tanh %58 : vector<128x128xf32>
    %cst_17 = arith.constant dense<0.000000e+00> : vector<128xf32>
    %60 = vector.multi_reduction <add>, %59, %cst_17 [0] : vector<128x128xf32> to vector<128xf32>
    %61 = vector.shape_cast %60 : vector<128xf32> to vector<1x128xf32>
    %62 = arith.mulf %59, %59 : vector<128x128xf32>
    %cst_18 = arith.constant dense<0.000000e+00> : vector<128xf32>
    %63 = vector.multi_reduction <add>, %62, %cst_18 [0] : vector<128x128xf32> to vector<128xf32>
    %64 = vector.shape_cast %63 : vector<128xf32> to vector<1x128xf32>
    %cst_19 = arith.constant 7.812500e-03 : f32
    %65 = vector.broadcast %cst_19 : f32 to vector<1x128xf32>
    %66 = arith.mulf %61, %65 : vector<1x128xf32>
    %cst_20 = arith.constant 7.812500e-03 : f32
    %67 = vector.broadcast %cst_20 : f32 to vector<1x128xf32>
    %68 = arith.mulf %64, %67 : vector<1x128xf32>
    %69 = arith.mulf %66, %66 : vector<1x128xf32>
    %70 = arith.subf %68, %69 : vector<1x128xf32>
    %cst_21 = arith.constant 8.000000e-01 : f32
    %71 = vector.broadcast %cst_21 : f32 to vector<1x128xf32>
    %72 = arith.addf %70, %71 : vector<1x128xf32>
    %73 = math.rsqrt %72 : vector<1x128xf32>
    %74 = arith.mulf %73, %8 : vector<1x128xf32>
    %75 = vector.broadcast %66 : vector<1x128xf32> to vector<128x128xf32>
    %76 = arith.subf %59, %75 : vector<128x128xf32>
    %77 = vector.broadcast %74 : vector<1x128xf32> to vector<128x128xf32>
    %78 = arith.mulf %76, %77 : vector<128x128xf32>
    %79 = vector.broadcast %9 : vector<1x128xf32> to vector<128x128xf32>
    %80 = arith.addf %78, %79 : vector<128x128xf32>
    %81 = arith.truncf %80 : vector<128x128xf32> to vector<128x128xbf16>
    %cst_22 = arith.constant dense<0.000000e+00> : vector<128x128xf32>
    %82 = tpu.matmul %81, %40, %cst_22 {dimension_numbers = #tpu.dot_dimension_numbers<[1], [0], [0], [1], [0, 0, 1, 1], [], []>} : vector<128x128xbf16>, vector<128x128xbf16>, vector<128x128xf32> -> vector<128x128xf32>
    %83 = vector.broadcast %10 : vector<1x128xf32> to vector<128x128xf32>
    %84 = arith.addf %82, %83 : vector<128x128xf32>
    %85 = arith.subf %44, %84 : vector<128x128xf32>
    %86 = vector.broadcast %11 : vector<1x128xf32> to vector<128x128xf32>
    %87 = arith.mulf %86, %85 : vector<128x128xf32>
    %88 = arith.addf %84, %87 : vector<128x128xf32>
    %c0_23 = arith.constant 0 : index
    %c0_24 = arith.constant 0 : index
    %c0_25 = arith.constant 0 : index
    %89 = vector.load %arg5[%c0_23, %c0_24, %c0_25] : memref<1x128x128xf32, #tpu.memory_space<vmem>>, vector<1x128x128xf32>
    %90 = vector.shape_cast %89 : vector<1x128x128xf32> to vector<128x128xf32>
    %91 = vector.shape_cast %88 : vector<128x128xf32> to vector<1x128x128xf32>
    tpu.vector_store %arg5[%c0_23, %c0_24, %c0_25], %91 {strides = array<i32>} : memref<1x128x128xf32, #tpu.memory_space<vmem>>, vector<1x128x128xf32>,
    return
  }
  func.func @transform_0(%arg0: i32) -> (i32, i32, i32) {
    %c0_i32 = arith.constant 0 : i32
    %c0_i32_0 = arith.constant 0 : i32
    %c0_i32_1 = arith.constant 0 : i32
    return %arg0, %c0_i32, %c0_i32_0 : i32, i32, i32
  }
  func.func @transform_1(%arg0: i32) -> (i32, i32) {
    %c0_i32 = arith.constant 0 : i32
    %c0_i32_0 = arith.constant 0 : i32
    %c0_i32_1 = arith.constant 0 : i32
    return %c0_i32, %c0_i32_0 : i32, i32
  }
  func.func @transform_2(%arg0: i32) -> (i32, i32) {
    %c0_i32 = arith.constant 0 : i32
    %c0_i32_0 = arith.constant 0 : i32
    %c0_i32_1 = arith.constant 0 : i32
    return %c0_i32, %c0_i32_0 : i32, i32
  }
  func.func @transform_3(%arg0: i32) -> (i32, i32) {
    %c0_i32 = arith.constant 0 : i32
    %c0_i32_0 = arith.constant 0 : i32
    %c0_i32_1 = arith.constant 0 : i32
    return %c0_i32, %c0_i32_0 : i32, i32
  }
  func.func @transform_4(%arg0: i32) -> (i32, i32, i32) {
    %c0_i32 = arith.constant 0 : i32
    %c0_i32_0 = arith.constant 0 : i32
    %c0_i32_1 = arith.constant 0 : i32
    return %arg0, %c0_i32, %c0_i32_0 : i32, i32, i32
  }
}

</mosaic_0001>

<bundles_post_ra>
// kernel: condvae_forward.1
= control target key start
LH: loop header
LB: loop body
LE: loop exit
PB: predicated region body
PF: predicated region fallthrough
CT: control target
= control target key end

     0   :  { %s1794_s15 = smov 0   ;;  %s2540_s0 = inlined_call_operand.vmem [shape: f32[4,128,128], index: 0, kind: input, shape index: {}]   ;;  %s2541_s1 = inlined_call_operand.vmem [shape: bf16[128,256], index: 1, kind: input, shape index: {}]   ;;  %s2542_s2 = inlined_call_operand.vmem [shape: bf16[144,128], index: 2, kind: input, shape index: {}]   ;;  %s2543_s3 = inlined_call_operand.vmem [shape: f32[8,128], index: 3, kind: input, shape index: {}]   ;;  %s2544_s4 = inlined_call_operand.vmem [shape: f32[4,128,128], index: 4, kind: output, shape index: {}]  }
   0x1 LB: > { %s1430_s16 = sadd.s32 4294967295, %s1765_s15   ;;  %p1434_p0 = scmp.ge.s32.totalorder %s1765_s15, 1  ;;  %s1765_s15 = sphi %s1794_s15, %s14_s15  }
   0x2   : > { %p162_p1 = scmp.lt.s32.totalorder %s1765_s15, 5 }
   0x4   : > { %p163_p2 = pnand %p1434_p0, %p162_p1 }
   0x6   : > { %166 = sbr.rel (%p163_p2) target bundleno = 1265 (0x4f1), region = 36 }
   0xd   : > { %v1625_v0 = vld [vmem:[%s2541_s1 + $0x4] ss:$8 sps:$4 sm:$0xff]   ;;  %v1627_v1 = vld [vmem:[%s2541_s1] ss:$8 sps:$4 sm:$0xff]   ;;  %v1767_v2 = vmov 0   ;;  %p188_p3 = scmp.lt.s32.totalorder %s1430_s16, 3  ;;  %v433_v49 = vlaneseq }
   0xe   : > { %352 = vmatprep.mubr.bf16.mxu0 %v1767_v2  ;;  %320 = vmatprep.subr.bf16.mxu0 %v1625_v0  ;;  %v1628_v3 = vld [vmem:[%s2541_s1 + $0x14] ss:$8 sps:$4 sm:$0xff]   ;;  %v1630_v4 = vld [vmem:[%s2541_s1 + $0x10] ss:$8 sps:$4 sm:$0xff]   ;;  %v1631_v5 = vld [vmem:[%s2541_s1 + $0x24] ss:$8 sps:$4 sm:$0xff]  }
   0xf   : > { %321 = vmatpush1.bf16.msra.mxu0 %v1627_v1  ;;  %v1633_v6 = vld [vmem:[%s2541_s1 + $0x20] ss:$8 sps:$4 sm:$0xff]   ;;  %v1634_v7 = vld [vmem:[%s2541_s1 + $0x34] ss:$8 sps:$4 sm:$0xff]   ;;  %v1636_v8 = vld [vmem:[%s2541_s1 + $0x30] ss:$8 sps:$4 sm:$0xff]  }
  0x10   : > { %322 = vmatprep.subr.bf16.mxu0 %v1628_v3  ;;  %s2578_s16 = smov (!%p188_p3, %s1430_s16), 3  ;;  %v1637_v9 = vld [vmem:[%s2541_s1 + $0x44] ss:$8 sps:$4 sm:$0xff]   ;;  %v1639_v10 = vld [vmem:[%s2541_s1 + $0x40] ss:$8 sps:$4 sm:$0xff]   ;;  %v1944_v42 = vld [vmem:[%s2542_s2 + $0x10] sm:$0xff]  }
  0x11   : > { %s1474_s11 = sshll.u32 %s2578_s16, 7  ;;  %v1640_v11 = vld [vmem:[%s2541_s1 + $0x54] ss:$8 sps:$4 sm:$0xff]   ;;  %v1642_v12 = vld [vmem:[%s2541_s1 + $0x50] ss:$8 sps:$4 sm:$0xff]   ;;  %v1935_v41 = vld [vmem:[%s2542_s2 + $0x8] sm:$0xff]  }
  0x12   : > { %v1643_v13 = vld [vmem:[%s2541_s1 + $0x64] ss:$8 sps:$4 sm:$0xff]   ;;  %v1645_v14 = vld [vmem:[%s2541_s1 + $0x60] ss:$8 sps:$4 sm:$0xff]   ;;  %v1646_v15 = vld [vmem:[%s2541_s1 + $0x74] ss:$8 sps:$4 sm:$0xff]   ;;  %s1856_s26 = scalar_lea.vmem %s2540_s0, %s1474_s11  ;;  %1517 = vmatprep.subr.bf16.mxu1 %v1935_v41  ;;  %s2487_s5 = scalar_lea.vmem %s2544_s4, %s1474_s11 }
  0x13   : > { %323 = vmatpush1.bf16.msra.mxu0 %v1630_v4  ;;  %v1648_v16 = vld [vmem:[%s2541_s1 + $0x70] ss:$8 sps:$4 sm:$0xff]   ;;  %v1862_v17 = vld [vmem:[%s1856_s26] sm:$0xff]  ;;  %v1865_v18 = vld [vmem:[%s1856_s26 + $0x8] sm:$0xff]  ;;  %1518 = vmatpush3.bf16.msra.mxu1 %v1935_v41  ;;  %v2004_v50 = vshrl.u32 %v433_v49, 7  ;;  %vm923_vm0 = vcmask 130048  }
  0x14   : > { %324 = vmatprep.subr.bf16.mxu0 %v1631_v5  ;;  %v232_v19 = vpack.c.bf16 %v1865_v18, %v1862_v17  ;;  %v1871_v20 = vld [vmem:[%s1856_s26 + $0x10] sm:$0xff]  ;;  %v1874_v21 = vld [vmem:[%s1856_s26 + $0x18] sm:$0xff]  ;;  %v1880_v23 = vld [vmem:[%s1856_s26 + $0x20] sm:$0xff]  ;;  %1519 = vmatprep.subr.bf16.mxu1 %v1944_v42 }
  0x15   : > { %v233_v22 = vpack.c.bf16 %v1874_v21, %v1871_v20  ;;  %v1883_v24 = vld [vmem:[%s1856_s26 + $0x28] sm:$0xff]  ;;  %v1889_v26 = vld [vmem:[%s1856_s26 + $0x30] sm:$0xff]  ;;  %v1892_v27 = vld [vmem:[%s1856_s26 + $0x38] sm:$0xff]  ;;  %v435_v51 = vsub.s32 0, %v2004_v50 }
  0x16   : > { %v234_v25 = vpack.c.bf16 %v1883_v24, %v1880_v23  ;;  %v235_v28 = vpack.c.bf16 %v1892_v27, %v1889_v26  ;;  %v1898_v29 = vld [vmem:[%s1856_s26 + $0x40] sm:$0xff]  ;;  %v1901_v30 = vld [vmem:[%s1856_s26 + $0x48] sm:$0xff]  ;;  %v1907_v32 = vld [vmem:[%s1856_s26 + $0x50] sm:$0xff] }
  0x17   : > { %325 = vmatpush1.bf16.msra.mxu0 %v1633_v6  ;;  %v236_v31 = vpack.c.bf16 %v1901_v30, %v1898_v29  ;;  %v1910_v33 = vld [vmem:[%s1856_s26 + $0x58] sm:$0xff]  ;;  %v1916_v35 = vld [vmem:[%s1856_s26 + $0x60] sm:$0xff]  ;;  %v1919_v36 = vld [vmem:[%s1856_s26 + $0x68] sm:$0xff]  ;;  %1520 = vmatpush3.bf16.msra.mxu1 %v1944_v42 }
  0x18   : > { %326 = vmatprep.subr.bf16.mxu0 %v1634_v7  ;;  %v237_v34 = vpack.c.bf16 %v1910_v33, %v1907_v32  ;;  %v238_v37 = vpack.c.bf16 %v1919_v36, %v1916_v35  ;;  %v1925_v38 = vld [vmem:[%s1856_s26 + $0x70] sm:$0xff]  ;;  %v1928_v39 = vld [vmem:[%s1856_s26 + $0x78] sm:$0xff]  ;;  %v1962_v44 = vld [vmem:[%s2542_s2 + $0x20] sm:$0xff]   ;;  %s1768_s26 = smov 112  }
  0x19   : > { %v239_v40 = vpack.c.bf16 %v1928_v39, %v1925_v38  ;;  %v1953_v43 = vld [vmem:[%s2542_s2 + $0x18] sm:$0xff]   ;;  %v1971_v45 = vld [vmem:[%s2542_s2 + $0x28] sm:$0xff]   ;;  %v1980_v46 = vld [vmem:[%s2542_s2 + $0x30] sm:$0xff]  }
  0x1a   : > { %1521 = vmatprep.subr.bf16.mxu1 %v1953_v43  ;;  %v1989_v47 = vld [vmem:[%s2542_s2 + $0x38] sm:$0xff]   ;;  %v1994_v48 = vld [vmem:[%s2542_s2 + $0x40] sm:$0xff]  }
  0x1b   : > { %327 = vmatpush1.bf16.msra.mxu0 %v1636_v8  ;;  %1522 = vmatpush3.bf16.msra.mxu1 %v1953_v43  ;;  %v2010_v52 = vld [vmem:[%s2543_s3] sm:$0xff] }
  0x1c   : > { %328 = vmatprep.subr.bf16.mxu0 %v1637_v9  ;;  %1523 = vmatprep.subr.bf16.mxu1 %v1962_v44  ;;  %v2013_v53 = vrot.slane %v2010_v52, %v435_v51 }
  0x1f   : > { %329 = vmatpush1.bf16.msra.mxu0 %v1639_v10  ;;  %1524 = vmatpush3.bf16.msra.mxu1 %v1962_v44 }
  0x20   : > { %330 = vmatprep.subr.bf16.mxu0 %v1640_v11  ;;  %1525 = vmatprep.subr.bf16.mxu1 %v1971_v45 }
  0x23   : > { %331 = vmatpush1.bf16.msra.mxu0 %v1642_v12  ;;  %1526 = vmatpush3.bf16.msra.mxu1 %v1971_v45 }
  0x24   : > { %332 = vmatprep.subr.bf16.mxu0 %v1643_v13  ;;  %1527 = vmatprep.subr.bf16.mxu1 %v1980_v46 }
  0x27   : > { %333 = vmatpush1.bf16.msra.mxu0 %v1645_v14  ;;  %1528 = vmatpush3.bf16.msra.mxu1 %v1980_v46 }
  0x28   : > { %334 = vmatprep.subr.bf16.mxu0 %v1646_v15  ;;  %1529 = vmatprep.subr.bf16.mxu1 %v1989_v47 }
  0x2b   : > { %335 = vmatpush1.bf16.msra.mxu0 %v1648_v16  ;;  %1530 = vmatpush3.bf16.msra.mxu1 %v1989_v47 }
  0x2c   : > { %1567 = vmatprep.subr.bf16.mxu0 %v1935_v41  ;;  %1531 = vmatprep.subr.bf16.mxu1 %v1994_v48 }
  0x2e   : > { %353 = vmatmul.mubr.bf16.vlgmr.msra.gmra.mrb[0].mxu0 %v232_v19 }
  0x2f   : > { %362 = vmatprep.mubr.bf16.mxu0 %v1767_v2  ;;  %1568 = vmatpush3.bf16.msra.mxu0 %v1935_v41 }
  0x30   : > { %1569 = vmatprep.subr.bf16.mxu0 %v1944_v42  ;;  %1532 = vmatpush3.bf16.msra.mxu1 %v1994_v48 }
  0x33   : > { %1570 = vmatpush3.bf16.msra.mxu0 %v1944_v42 }
  0x34   : > { %1571 = vmatprep.subr.bf16.mxu0 %v1953_v43 }
  0x36   : > { %363 = vmatmul.mubr.bf16.gmra.mrb[4].mxu0 %v233_v22 }
  0x37   : > { %372 = vmatprep.mubr.bf16.mxu0 %v1767_v2  ;;  %1572 = vmatpush3.bf16.msra.mxu0 %v1953_v43 }
  0x38   : > { %1573 = vmatprep.subr.bf16.mxu0 %v1962_v44 }
  0x3b   : > { %1574 = vmatpush3.bf16.msra.mxu0 %v1962_v44 }
  0x3c   : > { %1575 = vmatprep.subr.bf16.mxu0 %v1971_v45 }
  0x3e   : > { %373 = vmatmul.mubr.bf16.gmra.mrb[8].mxu0 %v234_v25 }
  0x3f   : > { %382 = vmatprep.mubr.bf16.mxu0 %v1767_v2  ;;  %1576 = vmatpush3.bf16.msra.mxu0 %v1971_v45 }
  0x40   : > { %1577 = vmatprep.subr.bf16.mxu0 %v1980_v46 }
  0x43   : > { %1578 = vmatpush3.bf16.msra.mxu0 %v1980_v46 }
  0x44   : > { %1579 = vmatprep.subr.bf16.mxu0 %v1989_v47 }
  0x46   : > { %383 = vmatmul.mubr.bf16.gmra.mrb[12].mxu0 %v235_v28 }
  0x47   : > { %392 = vmatprep.mubr.bf16.mxu0 %v1767_v2  ;;  %1580 = vmatpush3.bf16.msra.mxu0 %v1989_v47 }
  0x48   : > { %1581 = vmatprep.subr.bf16.mxu0 %v1994_v48 }
  0x4b   : > { %1582 = vmatpush3.bf16.msra.mxu0 %v1994_v48 }
  0x4e   : > { %393 = vmatmul.mubr.bf16.gmra.mrb[16].mxu0 %v236_v31 }
  0x4f   : > { %402 = vmatprep.mubr.bf16.mxu0 %v1767_v2 }
  0x56   : > { %403 = vmatmul.mubr.bf16.gmra.mrb[20].mxu0 %v237_v34 }
  0x57   : > { %412 = vmatprep.mubr.bf16.mxu0 %v1767_v2 }
  0x5e   : > { %413 = vmatmul.mubr.bf16.gmra.mrb[24].mxu0 %v238_v37 }
  0x5f   : > { %422 = vmatprep.mubr.bf16.mxu0 %v1767_v2 }
  0x66   : > { %423 = vmatmul.mubr.bf16.gmra.mrb[28].mxu0 %v239_v40 }
 0x101   : > { %v354_v54 = vpop.f32.mrb[0].mxu0 }
 0x102   : > { %v437_v55 = vadd.f32 %v2013_v53, %v354_v54  ;;  %v2016_v56 = vpop.f32.mrb[1].mxu0 }
 0x103   : > { %2545 = vst [vmem:[#allocation2_spill] sm:$0xff] %v2016_v56  ;;  %v358_v57 = vpop.f32.mrb[2].mxu0 }
 0x104   : > { %1658 = vtanh.f32 %v437_v55  ;;  %v438_v58 = vadd.f32 %v2013_v53, %v358_v57  ;;  %v2019_v59 = vpop.f32.mrb[3].mxu0 }
 0x105   : > { %2546 = vst [vmem:[#allocation3_spill] sm:$0xff] %v2019_v59 }
 0x106   : > { %1660 = vtanh.f32 %v438_v58 }
 0x109   : > { %v364_v60 = vpop.f32.mrb[4].mxu0 }
 0x10a   : > { %v439_v61 = vadd.f32 %v2013_v53, %v364_v60  ;;  %v2022_v62 = vpop.f32.mrb[5].mxu0 }
 0x10b   : > { %2547 = vst [vmem:[#allocation4_spill] sm:$0xff] %v2022_v62  ;;  %v368_v63 = vpop.f32.mrb[6].mxu0 }
 0x10c   : > { %1662 = vtanh.f32 %v439_v61  ;;  %v440_v0 = vadd.f32 %v2013_v53, %v368_v63  ;;  %v2025_v1 = vpop.f32.mrb[7].mxu0 }
 0x10d   : > { %2548 = vst [vmem:[#allocation5_spill] sm:$0xff] %v2025_v1 }
 0x10e   : > { %v2027_v2 = vpop.eup %1658  ;;  %1664 = vtanh.f32 %v440_v0 }
 0x10f   : > { %v490_v4 = vmul.f32 %v2027_v2, %v2027_v2 }
 0x110   : > { %v2029_v3 = vpop.eup %1660 }
 0x111   : > { %v469_v5 = vadd.f32 %v2029_v3, %v2027_v2  ;;  %v491_v6 = vmul.f32 %v2029_v3, %v2029_v3  ;;  %v374_v7 = vpop.f32.mrb[8].mxu0 }
 0x112   : > { %v441_v8 = vadd.f32 %v2013_v53, %v374_v7  ;;  %v2038_v9 = vpop.f32.mrb[9].mxu0 }
 0x113   : > { %2549 = vst [vmem:[#allocation6_spill] sm:$0xff] %v2038_v9  ;;  %v506_v10 = vadd.f32 %v491_v6, %v490_v4  ;;  %v378_v11 = vpop.f32.mrb[10].mxu0 }
 0x114   : > { %1666 = vtanh.f32 %v441_v8  ;;  %v442_v12 = vadd.f32 %v2013_v53, %v378_v11  ;;  %v2041_v13 = vpop.f32.mrb[11].mxu0 }
 0x115   : > { %2550 = vst [vmem:[#allocation7_spill] sm:$0xff] %v2041_v13 }
 0x116   : > { %v2043_v14 = vpop.eup %1662  ;;  %1668 = vtanh.f32 %v442_v12 }
 0x117   : > { %v470_v15 = vadd.f32 %v2043_v14, %v469_v5  ;;  %v492_v16 = vmul.f32 %v2043_v14, %v2043_v14 }
 0x118   : > { %v2048_v19 = vpop.eup %1664 }
 0x119   : > { %v507_v22 = vadd.f32 %v506_v10, %v492_v16  ;;  %v471_v25 = vadd.f32 %v2048_v19, %v470_v15  ;;  %v493_v28 = vmul.f32 %v2048_v19, %v2048_v19  ;;  %v384_v31 = vpop.f32.mrb[12].mxu0 }
 0x11a   : > { %v443_v34 = vadd.f32 %v2013_v53, %v384_v31  ;;  %v2054_v37 = vpop.f32.mrb[13].mxu0 }
 0x11b   : > { %2551 = vst [vmem:[#allocation8_spill] sm:$0xff] %v2054_v37  ;;  %v508_v40 = vadd.f32 %v507_v22, %v493_v28  ;;  %v388_v49 = vpop.f32.mrb[14].mxu0 }
 0x11c   : > { %1670 = vtanh.f32 %v443_v34  ;;  %v444_v51 = vadd.f32 %v2013_v53, %v388_v49  ;;  %v2057_v54 = vpop.f32.mrb[15].mxu0 }
 0x11d   : > { %2552 = vst [vmem:[#allocation9_spill] sm:$0xff] %v2057_v54 }
 0x11e   : > { %v2059_v55 = vpop.eup %1666  ;;  %1672 = vtanh.f32 %v444_v51 }
 0x11f   : > { %v472_v57 = vadd.f32 %v2059_v55, %v471_v25  ;;  %v494_v58 = vmul.f32 %v2059_v55, %v2059_v55 }
 0x120   : > { %v2064_v60 = vpop.eup %1668 }
 0x121   : > { %v509_v61 = vadd.f32 %v508_v40, %v494_v58  ;;  %v473_v63 = vadd.f32 %v2064_v60, %v472_v57  ;;  %v495_v0 = vmul.f32 %v2064_v60, %v2064_v60  ;;  %v394_v4 = vpop.f32.mrb[16].mxu0 }
 0x122   : > { %v445_v5 = vadd.f32 %v2013_v53, %v394_v4  ;;  %v2070_v6 = vpop.f32.mrb[17].mxu0 }
 0x123   : > { %2553 = vst [vmem:[#allocation10_spill] sm:$0xff] %v2070_v6  ;;  %v510_v7 = vadd.f32 %v509_v61, %v495_v0  ;;  %v398_v8 = vpop.f32.mrb[18].mxu0 }
 0x124   : > { %1674 = vtanh.f32 %v445_v5  ;;  %v446_v10 = vadd.f32 %v2013_v53, %v398_v8  ;;  %v2073_v11 = vpop.f32.mrb[19].mxu0 }
 0x125   : > { %2554 = vst [vmem:[#allocation11_spill] sm:$0xff] %v2073_v11 }
 0x126   : > { %v2075_v12 = vpop.eup %1670  ;;  %1676 = vtanh.f32 %v446_v10 }
 0x127   : > { %v474_v15 = vadd.f32 %v2075_v12, %v473_v63  ;;  %v496_v16 = vmul.f32 %v2075_v12, %v2075_v12 }
 0x128   : > { %v2080_v22 = vpop.eup %1672 }
 0x129   : > { %v511_v25 = vadd.f32 %v510_v7, %v496_v16  ;;  %v475_v28 = vadd.f32 %v2080_v22, %v474_v15  ;;  %v497_v31 = vmul.f32 %v2080_v22, %v2080_v22  ;;  %v404_v34 = vpop.f32.mrb[20].mxu0 }
 0x12a   : > { %v447_v40 = vadd.f32 %v2013_v53, %v404_v34  ;;  %v2086_v49 = vpop.f32.mrb[21].mxu0 }
 0x12b   : > { %2555 = vst [vmem:[#allocation12_spill] sm:$0xff] %v2086_v49  ;;  %v512_v51 = vadd.f32 %v511_v25, %v497_v31  ;;  %v408_v57 = vpop.f32.mrb[22].mxu0 }
 0x12c   : > { %1678 = vtanh.f32 %v447_v40  ;;  %v448_v58 = vadd.f32 %v2013_v53, %v408_v57  ;;  %v2089_v61 = vpop.f32.mrb[23].mxu0 }
 0x12d   : > { %2556 = vst [vmem:[#allocation13_spill] sm:$0xff] %v2089_v61 }
 0x12e   : > { %v2091_v63 = vpop.eup %1674  ;;  %1680 = vtanh.f32 %v448_v58 }
 0x12f   : > { %v476_v0 = vadd.f32 %v2091_v63, %v475_v28  ;;  %v498_v4 = vmul.f32 %v2091_v63, %v2091_v63 }
 0x130   : > { %v2096_v5 = vpop.eup %1676 }
 0x131   : > { %v513_v7 = vadd.f32 %v512_v51, %v498_v4  ;;  %v477_v8 = vadd.f32 %v2096_v5, %v476_v0  ;;  %v499_v10 = vmul.f32 %v2096_v5, %v2096_v5  ;;  %v414_v15 = vpop.f32.mrb[24].mxu0 }
 0x132   : > { %v449_v16 = vadd.f32 %v2013_v53, %v414_v15  ;;  %v2102_v25 = vpop.f32.mrb[25].mxu0 }
 0x133   : > { %2557 = vst [vmem:[#allocation14_spill] sm:$0xff] %v2102_v25  ;;  %v514_v31 = vadd.f32 %v513_v7, %v499_v10  ;;  %v418_v34 = vpop.f32.mrb[26].mxu0 }
 0x134   : > { %1682 = vtanh.f32 %v449_v16  ;;  %v450_v28 = vadd.f32 %v2013_v53, %v418_v34  ;;  %v2105_v40 = vpop.f32.mrb[27].mxu0 }
 0x135   : > { %2558 = vst [vmem:[#allocation15_spill] sm:$0xff] %v2105_v40 }
 0x136   : > { %v2107_v57 = vpop.eup %1678  ;;  %1684 = vtanh.f32 %v450_v28 }
 0x137   : > { %v478_v51 = vadd.f32 %v2107_v57, %v477_v8  ;;  %v500_v58 = vmul.f32 %v2107_v57, %v2107_v57 }
 0x138   : > { %v2112_v0 = vpop.eup %1680 }
 0x139   : > { %v515_v4 = vadd.f32 %v514_v31, %v500_v58  ;;  %v479_v15 = vadd.f32 %v2112_v0, %v478_v51  ;;  %v501_v7 = vmul.f32 %v2112_v0, %v2112_v0  ;;  %v424_v10 = vpop.f32.mrb[28].mxu0 }
 0x13a   : > { %v451_v16 = vadd.f32 %v2013_v53, %v424_v10  ;;  %v2118_v34 = vpop.f32.mrb[29].mxu0 }
 0x13b   : > { %2559 = vst [vmem:[#allocation16_spill] sm:$0xff] %v2118_v34  ;;  %v516_v40 = vadd.f32 %v515_v4, %v501_v7  ;;  %v428_v28 = vpop.f32.mrb[30].mxu0 }
 0x13c   : > { %1686 = vtanh.f32 %v451_v16  ;;  %v452_v8 = vadd.f32 %v2013_v53, %v428_v28  ;;  %v2121_v25 = vpop.f32.mrb[31].mxu0 }
 0x13d   : > { %2560 = vst [vmem:[#allocation17_spill] sm:$0xff] %v2121_v25 }
 0x13e   : > { %v2123_v11 = vpop.eup %1682  ;;  %1688 = vtanh.f32 %v452_v8 }
 0x13f   : > { %v480_v31 = vadd.f32 %v2123_v11, %v479_v15  ;;  %v502_v51 = vmul.f32 %v2123_v11, %v2123_v11 }
 0x140   : > { %v2128_v58 = vpop.eup %1684 }
 0x141   : > { %v517_v10 = vadd.f32 %v516_v40, %v502_v51  ;;  %v481_v34 = vadd.f32 %v2128_v58, %v480_v31  ;;  %v503_v4 = vmul.f32 %v2128_v58, %v2128_v58 }
 0x143   : > { %v518_v7 = vadd.f32 %v517_v10, %v503_v4 }
 0x146   : > { %v2133_v53 = vpop.eup %1686 }
 0x147   : > { %v482_v16 = vadd.f32 %v2133_v53, %v481_v34  ;;  %v504_v28 = vmul.f32 %v2133_v53, %v2133_v53 }
 0x148   : > { %v2138_v15 = vpop.eup %1688 }
 0x149   : > { %v519_v8 = vadd.f32 %v518_v7, %v504_v28  ;;  %v483_v25 = vadd.f32 %v2138_v15, %v482_v16  ;;  %v505_v40 = vmul.f32 %v2138_v15, %v2138_v15 }
 0x14b   : > { %v484_v31 = vrot.slane %v483_v25, 4  ;;  %v520_v51 = vadd.f32 %v519_v8, %v505_v40 }
 0x14d   : > { %v485_v61 = vadd.f32 %v484_v31, %v483_v25  ;;  %v521_v6 = vrot.slane %v520_v51, 4 }
 0x14f   : > { %v486_v10 = vrot.slane %v485_v61, 2  ;;  %v522_v4 = vadd.f32 %v521_v6, %v520_v51 }
 0x151   : > { %v487_v49 = vadd.f32 %v486_v10, %v485_v61  ;;  %v523_v13 = vrot.slane %v522_v4, 2 }
 0x153   : > { %v488_v34 = vrot.slane %v487_v49, 1  ;;  %v524_v54 = vadd.f32 %v523_v13, %v522_v4 }
 0x155   : > { %v489_v9 = vadd.f32 %v488_v34, %v487_v49  ;;  %v525_v37 = vrot.slane %v524_v54, 1 }
 0x157   : > { %v526_v59 = vadd.f32 %v525_v37, %v524_v54  ;;  %v527_v1 = vmul.f32 0.0078125, %v489_v9 }
 0x159   : > { %v528_v7 = vmul.f32 0.0078125, %v526_v59  ;;  %v529_v28 = vmul.f32 %v527_v1, %v527_v1  ;;  %v534_v16 = vsub.f32 %v2027_v2, %v527_v1  ;;  %v535_v56 = vsub.f32 %v2029_v3, %v527_v1 }
 0x15a   : > { %v536_v8 = vsub.f32 %v2043_v14, %v527_v1  ;;  %v537_v25 = vsub.f32 %v2048_v19, %v527_v1  ;;  %v538_v6 = vsub.f32 %v2059_v55, %v527_v1  ;;  %v539_v61 = vsub.f32 %v2064_v60, %v527_v1 }
 0x15b   : > { %v530_v40 = vsub.f32 %v528_v7, %v529_v28  ;;  %v540_v13 = vsub.f32 %v2075_v12, %v527_v1  ;;  %v541_v37 = vsub.f32 %v2080_v22, %v527_v1  ;;  %v542_v59 = vsub.f32 %v2091_v63, %v527_v1 }
 0x15c   : > { %v543_v9 = vsub.f32 %v2096_v5, %v527_v1  ;;  %v544_v2 = vsub.f32 %v2107_v57, %v527_v1  ;;  %v545_v3 = vsub.f32 %v2112_v0, %v527_v1  ;;  %v546_v14 = vsub.f32 %v2123_v11, %v527_v1 }
 0x15d   : > { %v531_v19 = vadd.f32 0.8, %v530_v40  ;;  %v547_v54 = vsub.f32 %v2128_v58, %v527_v1  ;;  %v548_v55 = vsub.f32 %v2133_v53, %v527_v1  ;;  %v549_v60 = vsub.f32 %v2138_v15, %v527_v1 }
 0x15e   : > { %v552_v12 = vsub.s32 1, %v2004_v50  ;;  %v572_v22 = vsub.s32 2, %v2004_v50 }
 0x15f   : > { %1690 = vrsqrt.f32 %v531_v19 }
 0x160   : > { %v573_v57 = vrot.slane %v2010_v52, %v572_v22 }
 0x169   : > { %v1691_v49 = vpop.eup %1690 }
 0x16a   : > { %v533_v63 = vmul.f32 %v1691_v49, %v2010_v52 }
 0x16c   : > { %v553_v5 = vrot.slane %v533_v63, %v552_v12 }
 0x16e   : > { %v554_v0 = vmul.f32 %v553_v5, %v534_v16  ;;  %v555_v11 = vmul.f32 %v553_v5, %v535_v56  ;;  %v556_v31 = vmul.f32 %v553_v5, %v536_v8  ;;  %v557_v51 = vmul.f32 %v553_v5, %v537_v25 }
 0x16f   : > { %v558_v58 = vmul.f32 %v553_v5, %v538_v6  ;;  %v559_v10 = vmul.f32 %v553_v5, %v539_v61  ;;  %v560_v53 = vmul.f32 %v553_v5, %v540_v13  ;;  %v561_v4 = vmul.f32 %v553_v5, %v541_v37 }
 0x170   : > { %v574_v1 = vadd.f32 %v573_v57, %v554_v0  ;;  %v575_v15 = vadd.f32 %v573_v57, %v555_v11  ;;  %v576_v34 = vadd.f32 %v573_v57, %v556_v31  ;;  %v577_v7 = vadd.f32 %v573_v57, %v557_v51 }
 0x171   : > { %v578_v28 = vadd.f32 %v573_v57, %v558_v58  ;;  %v579_v40 = vadd.f32 %v573_v57, %v559_v10  ;;  %v580_v19 = vadd.f32 %v573_v57, %v560_v53  ;;  %v581_v62 = vadd.f32 %v573_v57, %v561_v4 }
 0x172   : > { %v606_v49 = vpack.c.bf16 %v575_v15, %v574_v1  ;;  %v607_v12 = vpack.c.bf16 %v577_v7, %v576_v34  ;;  %v562_v63 = vmul.f32 %v553_v5, %v542_v59  ;;  %v563_v22 = vmul.f32 %v553_v5, %v543_v9 }
 0x173   : > { %v608_v16 = vpack.c.bf16 %v579_v40, %v578_v28  ;;  %v609_v56 = vpack.c.bf16 %v581_v62, %v580_v19  ;;  %v564_v8 = vmul.f32 %v553_v5, %v544_v2  ;;  %v565_v25 = vmul.f32 %v553_v5, %v545_v3  ;;  %v1657_v3 = vld [vmem:[%s2542_s2] sm:$0xff]  }
 0x174   : > { %1533 = vmatprep.mubr.bf16.mxu1 %v606_v49  ;;  %v582_v6 = vadd.f32 %v573_v57, %v562_v63  ;;  %v583_v61 = vadd.f32 %v573_v57, %v563_v22  ;;  %v566_v13 = vmul.f32 %v553_v5, %v546_v14  ;;  %v567_v37 = vmul.f32 %v553_v5, %v547_v54 }
 0x175   : > { %1534 = vmatmul.mubr.bf16.vlgmr.msra.gmra.mrb[0].mxu1 %v607_v12  ;;  %v584_v0 = vadd.f32 %v573_v57, %v564_v8  ;;  %v585_v11 = vadd.f32 %v573_v57, %v565_v25  ;;  %v568_v31 = vmul.f32 %v553_v5, %v548_v55  ;;  %v569_v51 = vmul.f32 %v553_v5, %v549_v60 }
 0x176   : > { %1537 = vmatprep.mubr.bf16.mxu1 %v608_v16  ;;  %v610_v58 = vpack.c.bf16 %v583_v61, %v582_v6  ;;  %v586_v10 = vadd.f32 %v573_v57, %v566_v13  ;;  %v587_v53 = vadd.f32 %v573_v57, %v567_v37  ;;  %1549 = vmatprep.subr.bf16.mxu1 %v1657_v3  ;;  %v616_v14 = vsub.s32 6, %v2004_v50 }
 0x177   : > { %v611_v59 = vpack.c.bf16 %v585_v11, %v584_v0  ;;  %v588_v9 = vadd.f32 %v573_v57, %v568_v31  ;;  %v589_v4 = vadd.f32 %v573_v57, %v569_v51  ;;  %1550 = vmatpush3.bf16.msra.mxu1 %v1657_v3 }
 0x178   : > { %v612_v62 = vpack.c.bf16 %v587_v53, %v586_v10  ;;  %1599 = vmatprep.subr.bf16.mxu1 %v1935_v41  ;;  %v2169_v54 = vrot.slane %v2010_v52, %v616_v14 }
 0x179   : > { %v613_v2 = vpack.c.bf16 %v589_v4, %v588_v9 }
 0x17d   : > { %1538 = vmatmul.mubr.bf16.gmra.mrb[4].mxu1 %v609_v56 }
 0x17e   : > { %1541 = vmatprep.mubr.bf16.mxu1 %v610_v58 }
 0x185   : > { %1542 = vmatmul.mubr.bf16.gmra.mrb[8].mxu1 %v611_v59 }
 0x186   : > { %1545 = vmatprep.mubr.bf16.mxu1 %v612_v62 }
 0x18d   : > { %1546 = vmatmul.mubr.bf16.gmra.mrb[12].mxu1 %v613_v2 }
 0x248   : > { %v1535_v55 = vpop.f32.mrb[0].mxu1 }
 0x249   : > { %v2172_v60 = vadd.f32 %v1535_v55, %v2169_v54  ;;  %v700_v5 = vpop.f32.mrb[1].mxu1 }
 0x24a   : > { %v2175_v57 = vadd.f32 %v700_v5, %v2169_v54  ;;  %v1536_v1 = vpop.f32.mrb[2].mxu1 }
 0x24b   : > { %v765_v15 = vmul.f32 0.5, %v2172_v60  ;;  %v2179_v34 = vadd.f32 %v1536_v1, %v2169_v54  ;;  %v703_v7 = vpop.f32.mrb[3].mxu1 }
 0x24c   : > { %v763_v28 = vmul.f32 0.5, %v2175_v57  ;;  %v2183_v40 = vadd.f32 %v703_v7, %v2169_v54 }
 0x24d   : > { %v783_v19 = vmul.f32 1.442695, %v765_v15  ;;  %v766_v49 = vmul.f32 0.5, %v2179_v34 }
 0x24e   : > { %v779_v12 = vmul.f32 1.442695, %v763_v28  ;;  %v764_v63 = vmul.f32 0.5, %v2183_v40 }
 0x24f   : > { %1692 = vpow2.f32 %v783_v19  ;;  %v785_v22 = vmul.f32 1.442695, %v766_v49 }
 0x250   : > { %1694 = vpow2.f32 %v779_v12  ;;  %v781_v16 = vmul.f32 1.442695, %v764_v63  ;;  %v1539_v56 = vpop.f32.mrb[4].mxu1 }
 0x251   : > { %1696 = vpow2.f32 %v785_v22  ;;  %v2188_v8 = vadd.f32 %v1539_v56, %v2169_v54  ;;  %v716_v25 = vpop.f32.mrb[5].mxu1 }
 0x252   : > { %1698 = vpow2.f32 %v781_v16  ;;  %v2191_v6 = vadd.f32 %v716_v25, %v2169_v54  ;;  %v1540_v61 = vpop.f32.mrb[6].mxu1 }
 0x253   : > { %v769_v13 = vmul.f32 0.5, %v2188_v8  ;;  %v2195_v37 = vadd.f32 %v1540_v61, %v2169_v54  ;;  %v719_v0 = vpop.f32.mrb[7].mxu1 }
 0x254   : > { %v767_v11 = vmul.f32 0.5, %v2191_v6  ;;  %v2199_v31 = vadd.f32 %v719_v0, %v2169_v54 }
 0x255   : > { %v791_v51 = vmul.f32 1.442695, %v769_v13  ;;  %v770_v58 = vmul.f32 0.5, %v2195_v37 }
 0x256   : > { %v787_v10 = vmul.f32 1.442695, %v767_v11  ;;  %v768_v53 = vmul.f32 0.5, %v2199_v31 }
 0x257   : > { %v793_v59 = vmul.f32 1.442695, %v770_v58 }
 0x258   : > { %1700 = vpow2.f32 %v787_v10  ;;  %v789_v9 = vmul.f32 1.442695, %v768_v53  ;;  %v1543_v4 = vpop.f32.mrb[8].mxu1 }
 0x259   : > { %v1693_v62 = vpop.eup %1692  ;;  %1702 = vpow2.f32 %v791_v51  ;;  %v2204_v2 = vadd.f32 %v1543_v4, %v2169_v54  ;;  %v732_v3 = vpop.f32.mrb[9].mxu1 }
 0x25a   : > { %v1695_v14 = vpop.eup %1694  ;;  %1704 = vpow2.f32 %v789_v9  ;;  %v2207_v55 = vadd.f32 %v732_v3, %v2169_v54  ;;  %v1544_v5 = vpop.f32.mrb[10].mxu1  ;;  %v813_v1 = vmul.f32 %v1693_v62, %v1871_v20 }
 0x25b   : > { %v1697_v15 = vpop.eup %1696  ;;  %v773_v7 = vmul.f32 0.5, %v2204_v2  ;;  %v2212_v28 = vadd.f32 %v1544_v5, %v2169_v54  ;;  %v735_v19 = vpop.f32.mrb[11].mxu1  ;;  %v811_v49 = vmul.f32 %v1695_v14, %v1862_v17  ;;  %1706 = vpow2.f32 %v793_v59 }
 0x25c   : > { %v1699_v12 = vpop.eup %1698  ;;  %v771_v63 = vmul.f32 0.5, %v2207_v55  ;;  %v2217_v22 = vadd.f32 %v735_v19, %v2169_v54  ;;  %847 = vrot.lane.b32.xlu1 %v813_v1, %s1768_s26  ;;  %v814_v17 = vmul.f32 %v1697_v15, %v1874_v21 }
 0x25d   : > { %v799_v20 = vmul.f32 1.442695, %v773_v7  ;;  %v774_v16 = vmul.f32 0.5, %v2212_v28  ;;  %843 = vrot.lane.b32.xlu0 %v811_v49, %s1768_s26  ;;  %v812_v61 = vmul.f32 %v1699_v12, %v1865_v18 }
 0x25e   : > { %v795_v56 = vmul.f32 1.442695, %v771_v63  ;;  %v772_v25 = vmul.f32 0.5, %v2217_v22 }
 0x25f   : > { %v801_v13 = vmul.f32 1.442695, %v774_v16 }
 0x260   : > { %1708 = vpow2.f32 %v795_v56  ;;  %v797_v0 = vmul.f32 1.442695, %v772_v25  ;;  %849 = vrot.lane.b32.xlu1 %v814_v17, %s1768_s26  ;;  %v1547_v11 = vpop.f32.mrb[12].mxu1 }
 0x261   : > { %1710 = vpow2.f32 %v799_v20  ;;  %v2227_v51 = vadd.f32 %v1547_v11, %v2169_v54  ;;  %v748_v58 = vpop.f32.mrb[13].mxu1  ;;  %845 = vrot.lane.b32.xlu0 %v812_v61, %s1768_s26 }
 0x262   : > { %v1701_v10 = vpop.eup %1700  ;;  %1712 = vpow2.f32 %v797_v0  ;;  %v2231_v53 = vadd.f32 %v748_v58, %v2169_v54  ;;  %v1548_v21 = vpop.f32.mrb[14].mxu1 }
 0x263   : > { %v1703_v18 = vpop.eup %1702  ;;  %v777_v59 = vmul.f32 0.5, %v2227_v51  ;;  %v2235_v9 = vadd.f32 %v1548_v21, %v2169_v54  ;;  %v751_v4 = vpop.f32.mrb[15].mxu1  ;;  %v815_v62 = vmul.f32 %v1701_v10, %v1880_v23  ;;  %1714 = vpow2.f32 %v801_v13 }
 0x264   : > { %v1705_v3 = vpop.eup %1704  ;;  %v775_v14 = vmul.f32 0.5, %v2231_v53  ;;  %v2240_v5 = vadd.f32 %v751_v4, %v2169_v54  ;;  %v817_v23 = vmul.f32 %v1703_v18, %v1889_v26 }
 0x265   : > { %v807_v1 = vmul.f32 1.442695, %v777_v59  ;;  %v778_v15 = vmul.f32 0.5, %v2235_v9  ;;  %851 = vrot.lane.b32.xlu0 %v815_v62, %s1768_s26  ;;  %v816_v7 = vmul.f32 %v1705_v3, %v1883_v24  ;;  %v1707_v19 = vpop.eup %1706 }
 0x266   : > { %v803_v49 = vmul.f32 1.442695, %v775_v14  ;;  %v776_v12 = vmul.f32 0.5, %v2240_v5  ;;  %v818_v16 = vmul.f32 %v1707_v19, %v1892_v27 }
 0x267   : > { %853 = vrot.lane.b32.xlu1 %v816_v7, %s1768_s26  ;;  %v809_v63 = vmul.f32 1.442695, %v778_v15 }
 0x268   : > { %1716 = vpow2.f32 %v803_v49  ;;  %v805_v20 = vmul.f32 1.442695, %v776_v12 }
 0x269   : > { %1718 = vpow2.f32 %v807_v1  ;;  %855 = vrot.lane.b32.xlu0 %v817_v23, %s1768_s26 }
 0x26a   : > { %v1709_v56 = vpop.eup %1708  ;;  %1720 = vpow2.f32 %v805_v20 }
 0x26b   : > { %v1711_v25 = vpop.eup %1710  ;;  %857 = vrot.lane.b32.xlu1 %v818_v16, %s1768_s26  ;;  %v819_v24 = vmul.f32 %v1709_v56, %v1898_v29  ;;  %1722 = vpow2.f32 %v809_v63 }
 0x26c   : > { %v1713_v17 = vpop.eup %1712  ;;  %v821_v13 = vmul.f32 %v1711_v25, %v1907_v32 }
 0x26d   : > { %859 = vrot.lane.b32.xlu0 %v819_v24, %s1768_s26  ;;  %v820_v26 = vmul.f32 %v1713_v17, %v1901_v30  ;;  %v1715_v61 = vpop.eup %1714 }
 0x26e   : > { %v822_v27 = vmul.f32 %v1715_v61, %v1910_v33 }
 0x26f   : > { %861 = vrot.lane.b32.xlu1 %v820_v26, %s1768_s26 }
 0x271   : > { %863 = vrot.lane.b32.xlu0 %v821_v13, %s1768_s26 }
 0x272   : > { %v1717_v0 = vpop.eup %1716 }
 0x273   : > { %v1719_v11 = vpop.eup %1718  ;;  %865 = vrot.lane.b32.xlu1 %v822_v27, %s1768_s26  ;;  %v823_v29 = vmul.f32 %v1717_v0, %v1916_v35 }
 0x274   : > { %v1721_v58 = vpop.eup %1720  ;;  %v825_v32 = vmul.f32 %v1719_v11, %v1925_v38 }
 0x275   : > { %867 = vrot.lane.b32.xlu0 %v823_v29, %s1768_s26  ;;  %v824_v30 = vmul.f32 %v1721_v58, %v1919_v36  ;;  %v1723_v10 = vpop.eup %1722 }
 0x276   : > { %v826_v33 = vmul.f32 %v1723_v10, %v1928_v39 }
 0x277   : > { %869 = vrot.lane.b32.xlu1 %v824_v30, %s1768_s26 }
 0x279   : > { %871 = vrot.lane.b32.xlu0 %v825_v32, %s1768_s26 }
 0x27b   : > { %873 = vrot.lane.b32.xlu1 %v826_v33, %s1768_s26 }
 0x2ce   : > { %v848_v21 = vpop.permute.xlu1 %847 }
 0x2cf   : > { %v844_v18 = vpop.permute.xlu0 %843  ;;  %v893_v3 = vadd.f32 %v848_v21, %v2172_v60 }
 0x2d0   : > { %v891_v62 = vadd.f32 %v844_v18, %v2175_v57  ;;  %v2561_v18 = vld [vmem:[#allocation4_spill] sm:$0xff] }
 0x2d2   : > { %v850_v59 = vpop.permute.xlu1 %849 }
 0x2d3   : > { %v894_v35 = vadd.f32 %v850_v59, %v2179_v34  ;;  %v846_v4 = vpop.permute.xlu0 %845 }
 0x2d4   : > { %v892_v36 = vadd.f32 %v846_v4, %v2183_v40 }
 0x2d5   : > { %v910_v14 = vpack.c.bf16 %v894_v35, %v893_v3  ;;  %v2562_v35 = vld [vmem:[#allocation2_spill] sm:$0xff]  ;;  %v2563_v3 = vld [vmem:[#allocation5_spill] sm:$0xff] }
 0x2d6   : > { %v909_v38 = vpack.c.bf16 %v892_v36, %v891_v62 }
 0x2d7   : > { %v852_v1 = vpop.permute.xlu0 %851 }
 0x2d8   : > { %1551 = vmatprep.mubr.msk.bf16.mxu1 %vm923_vm0, %v909_v38  ;;  %v895_v15 = vadd.f32 %v852_v1, %v2191_v6 }
 0x2d9   : > { %v854_v39 = vpop.permute.xlu1 %853  ;;  %1552 = vmatmul.mubr.msk.bf16.vlgmr.msra.gmra.mrb[16].mxu1 %vm923_vm0, %v910_v14 }
 0x2da   : > { %v896_v7 = vadd.f32 %v854_v39, %v2199_v31  ;;  %1607 = vmatpush3.bf16.msra.mxu1 %v1935_v41 }
 0x2db   : > { %v856_v19 = vpop.permute.xlu0 %855  ;;  %1600 = vmatprep.subr.bf16.mxu1 %v1944_v42 }
 0x2dc   : > { %v911_v49 = vpack.c.bf16 %v896_v7, %v895_v15  ;;  %v897_v23 = vadd.f32 %v856_v19, %v2188_v8  ;;  %v2565_v7 = vld [vmem:[#allocation8_spill] sm:$0xff] }
 0x2dd   : > { %v858_v12 = vpop.permute.xlu1 %857 }
 0x2de   : > { %v898_v63 = vadd.f32 %v858_v12, %v2195_v37  ;;  %1555 = vmatprep.mubr.msk.bf16.mxu1 %vm923_vm0, %v911_v49  ;;  %1608 = vmatpush3.bf16.msra.mxu1 %v1944_v42  ;;  %v2566_v12 = vld [vmem:[#allocation6_spill] sm:$0xff] }
 0x2df   : > { %v860_v20 = vpop.permute.xlu0 %859  ;;  %1601 = vmatprep.subr.bf16.mxu1 %v1953_v43 }
 0x2e0   : > { %v912_v16 = vpack.c.bf16 %v898_v63, %v897_v23  ;;  %v899_v41 = vadd.f32 %v860_v20, %v2207_v55 }
 0x2e1   : > { %v862_v56 = vpop.permute.xlu1 %861 }
 0x2e2   : > { %v900_v25 = vadd.f32 %v862_v56, %v2217_v22  ;;  %1556 = vmatmul.mubr.msk.bf16.gmra.mrb[20].mxu1 %vm923_vm0, %v912_v16  ;;  %v2567_v16 = vld [vmem:[#allocation9_spill] sm:$0xff] }
 0x2e3   : > { %v864_v24 = vpop.permute.xlu0 %863  ;;  %1609 = vmatpush3.bf16.msra.mxu1 %v1953_v43 }
 0x2e4   : > { %v913_v17 = vpack.c.bf16 %v900_v25, %v899_v41  ;;  %1602 = vmatprep.subr.bf16.mxu1 %v1962_v44  ;;  %v901_v42 = vadd.f32 %v864_v24, %v2204_v2  ;;  %v2568_v24 = vld [vmem:[#allocation7_spill] sm:$0xff] }
 0x2e5   : > { %v866_v26 = vpop.permute.xlu1 %865 }
 0x2e6   : > { %v902_v61 = vadd.f32 %v866_v26, %v2212_v28  ;;  %1559 = vmatprep.mubr.msk.bf16.mxu1 %vm923_vm0, %v913_v17 }
 0x2e7   : > { %v868_v13 = vpop.permute.xlu0 %867  ;;  %1610 = vmatpush3.bf16.msra.mxu1 %v1962_v44 }
 0x2e8   : > { %v914_v27 = vpack.c.bf16 %v902_v61, %v901_v42  ;;  %1603 = vmatprep.subr.bf16.mxu1 %v1971_v45  ;;  %v903_v11 = vadd.f32 %v868_v13, %v2231_v53 }
 0x2e9   : > { %v870_v0 = vpop.permute.xlu1 %869 }
 0x2ea   : > { %v904_v43 = vadd.f32 %v870_v0, %v2240_v5  ;;  %1560 = vmatmul.mubr.msk.bf16.gmra.mrb[24].mxu1 %vm923_vm0, %v914_v27 }
 0x2eb   : > { %v872_v29 = vpop.permute.xlu0 %871  ;;  %1611 = vmatpush3.bf16.msra.mxu1 %v1971_v45  ;;  %v1047_v45 = vsub.s32 3, %v2004_v50 }
 0x2ec   : > { %v915_v58 = vpack.c.bf16 %v904_v43, %v903_v11  ;;  %1604 = vmatprep.subr.bf16.mxu1 %v1980_v46  ;;  %v905_v10 = vadd.f32 %v872_v29, %v2227_v51  ;;  %v2569_v11 = vld [vmem:[#allocation12_spill] sm:$0xff] }
 0x2ed   : > { %v874_v30 = vpop.permute.xlu1 %873  ;;  %v2308_v33 = vrot.slane %v2010_v52, %v1047_v45 }
 0x2ee   : > { %v906_v44 = vadd.f32 %v874_v30, %v2235_v9  ;;  %1563 = vmatprep.mubr.msk.bf16.mxu1 %vm923_vm0, %v915_v58 }
 0x2ef   : > { %1612 = vmatpush3.bf16.msra.mxu1 %v1980_v46 }
 0x2f0   : > { %v916_v32 = vpack.c.bf16 %v906_v44, %v905_v10  ;;  %1605 = vmatprep.subr.bf16.mxu1 %v1989_v47 }
 0x2f2   : > { %1564 = vmatmul.mubr.msk.bf16.gmra.mrb[28].mxu1 %vm923_vm0, %v916_v32  ;;  %v2570_v32 = vld [vmem:[#allocation10_spill] sm:$0xff] }
 0x2f3   : > { %1613 = vmatpush3.bf16.msra.mxu1 %v1989_v47 }
 0x2f4   : > { %1606 = vmatprep.subr.bf16.mxu1 %v1994_v48 }
 0x2f7   : > { %1614 = vmatpush3.bf16.msra.mxu1 %v1994_v48  ;;  %v2564_v48 = vld [vmem:[#allocation3_spill] sm:$0xff] }
 0x3ac   : > { %v1553_v21 = vpop.f32.mrb[16].mxu1 }
 0x3ad   : > { %v991_v59 = vadd.f32 %v1553_v21, %v2561_v18  ;;  %v982_v46 = vpop.f32.mrb[17].mxu1 }
 0x3ae   : > { %v983_v4 = vadd.f32 %v982_v46, %v2562_v35  ;;  %v1554_v62 = vpop.f32.mrb[18].mxu1  ;;  %v2571_v46 = vld [vmem:[#allocation13_spill] sm:$0xff] }
 0x3af   : > { %v1051_v36 = vadd.f32 %v2308_v33, %v991_v59  ;;  %v994_v47 = vadd.f32 %v1554_v62, %v2563_v3  ;;  %v985_v38 = vpop.f32.mrb[19].mxu1 }
 0x3b0   : > { %v1049_v14 = vadd.f32 %v2308_v33, %v983_v4  ;;  %v986_v1 = vadd.f32 %v985_v38, %v2564_v48 }
 0x3b1   : > { %v1052_v39 = vadd.f32 %v2308_v33, %v994_v47  ;;  %v2572_v47 = vld [vmem:[#allocation11_spill] sm:$0xff] }
 0x3b2   : > { %1724 = vtanh.f32 %v1049_v14  ;;  %v1050_v52 = vadd.f32 %v2308_v33, %v986_v1 }
 0x3b3   : > { %1726 = vtanh.f32 %v1051_v36 }
 0x3b4   : > { %1728 = vtanh.f32 %v1050_v52 }
 0x3b5   : > { %1730 = vtanh.f32 %v1052_v39  ;;  %v1557_v15 = vpop.f32.mrb[20].mxu1 }
 0x3b6   : > { %v1007_v19 = vadd.f32 %v1557_v15, %v2565_v7  ;;  %v998_v49 = vpop.f32.mrb[21].mxu1 }
 0x3b7   : > { %v999_v23 = vadd.f32 %v998_v49, %v2566_v12  ;;  %v1558_v63 = vpop.f32.mrb[22].mxu1 }
 0x3b8   : > { %v1055_v20 = vadd.f32 %v2308_v33, %v1007_v19  ;;  %v1010_v56 = vadd.f32 %v1558_v63, %v2567_v16  ;;  %v1001_v41 = vpop.f32.mrb[23].mxu1  ;;  %v2573_v63 = vld [vmem:[#allocation16_spill] sm:$0xff] }
 0x3b9   : > { %v1053_v25 = vadd.f32 %v2308_v33, %v999_v23  ;;  %v1002_v17 = vadd.f32 %v1001_v41, %v2568_v24  ;;  %v2574_v41 = vld [vmem:[#allocation14_spill] sm:$0xff] }
 0x3ba   : > { %v1056_v26 = vadd.f32 %v2308_v33, %v1010_v56 }
 0x3bb   : > { %1732 = vtanh.f32 %v1053_v25  ;;  %v1054_v42 = vadd.f32 %v2308_v33, %v1002_v17 }
 0x3bc   : > { %v2326_v61 = vpop.eup %1724  ;;  %1734 = vtanh.f32 %v1055_v20 }
 0x3bd   : > { %v2328_v13 = vpop.eup %1726  ;;  %1736 = vtanh.f32 %v1054_v42  ;;  %v1561_v27 = vpop.f32.mrb[24].mxu1  ;;  %v1102_v30 = vmul.f32 %v2326_v61, %v2326_v61 }
 0x3be   : > { %v2330_v0 = vpop.eup %1728  ;;  %1738 = vtanh.f32 %v1056_v26  ;;  %v1023_v43 = vadd.f32 %v1561_v27, %v2569_v11  ;;  %v1014_v29 = vpop.f32.mrb[25].mxu1  ;;  %v1104_v18 = vmul.f32 %v2328_v13, %v2328_v13 }
 0x3bf   : > { %v2333_v58 = vpop.eup %1730  ;;  %v1081_v10 = vadd.f32 %v2330_v0, %v2326_v61  ;;  %v1103_v44 = vmul.f32 %v2330_v0, %v2330_v0  ;;  %v1015_v45 = vadd.f32 %v1014_v29, %v2570_v32  ;;  %v1562_v21 = vpop.f32.mrb[26].mxu1 }
 0x3c0   : > { %v1059_v59 = vadd.f32 %v2308_v33, %v1023_v43  ;;  %v1026_v35 = vadd.f32 %v1562_v21, %v2571_v46  ;;  %v1017_v4 = vpop.f32.mrb[27].mxu1  ;;  %v1105_v14 = vmul.f32 %v2333_v58, %v2333_v58 }
 0x3c1   : > { %v1082_v62 = vadd.f32 %v2328_v13, %v1081_v10  ;;  %v1118_v36 = vadd.f32 %v1103_v44, %v1102_v30  ;;  %v1057_v3 = vadd.f32 %v2308_v33, %v1015_v45  ;;  %v1018_v38 = vadd.f32 %v1017_v4, %v2572_v47  ;;  %v2575_v30 = vld [vmem:[#allocation17_spill] sm:$0xff]  ;;  %v2576_v44 = vld [vmem:[#allocation15_spill] sm:$0xff] }
 0x3c2   : > { %v1060_v48 = vadd.f32 %v2308_v33, %v1026_v35 }
 0x3c3   : > { %v1119_v1 = vadd.f32 %v1118_v36, %v1104_v18  ;;  %v1083_v39 = vadd.f32 %v2333_v58, %v1082_v62  ;;  %1740 = vtanh.f32 %v1057_v3  ;;  %v1058_v52 = vadd.f32 %v2308_v33, %v1018_v38 }
 0x3c4   : > { %1742 = vtanh.f32 %v1059_v59 }
 0x3c5   : > { %v2354_v15 = vpop.eup %1732  ;;  %v1120_v7 = vadd.f32 %v1119_v1, %v1105_v14  ;;  %1744 = vtanh.f32 %v1058_v52  ;;  %v1565_v19 = vpop.f32.mrb[28].mxu1 }
 0x3c6   : > { %v2356_v49 = vpop.eup %1734  ;;  %v1084_v12 = vadd.f32 %v2354_v15, %v1083_v39  ;;  %v1106_v23 = vmul.f32 %v2354_v15, %v2354_v15  ;;  %v1039_v20 = vadd.f32 %v1565_v19, %v2573_v63  ;;  %v1030_v16 = vpop.f32.mrb[29].mxu1  ;;  %1746 = vtanh.f32 %v1060_v48 }
 0x3c7   : > { %v2362_v56 = vpop.eup %1736  ;;  %v1031_v25 = vadd.f32 %v1030_v16, %v2574_v41  ;;  %v1566_v24 = vpop.f32.mrb[30].mxu1  ;;  %v1108_v45 = vmul.f32 %v2356_v49, %v2356_v49 }
 0x3c8   : > { %v2365_v17 = vpop.eup %1738  ;;  %v1121_v26 = vadd.f32 %v1120_v7, %v1106_v23  ;;  %v1085_v42 = vadd.f32 %v2362_v56, %v1084_v12  ;;  %v1107_v27 = vmul.f32 %v2362_v56, %v2362_v56  ;;  %v1033_v11 = vpop.f32.mrb[31].mxu1  ;;  %v1063_v43 = vadd.f32 %v2308_v33, %v1039_v20 }
 0x3c9   : > { %v1061_v29 = vadd.f32 %v2308_v33, %v1031_v25  ;;  %v1042_v10 = vadd.f32 %v1566_v24, %v2575_v30  ;;  %v1034_v32 = vadd.f32 %v1033_v11, %v2576_v44  ;;  %v1109_v46 = vmul.f32 %v2365_v17, %v2365_v17 }
 0x3ca   : > { %v1086_v21 = vadd.f32 %v2356_v49, %v1085_v42  ;;  %v1122_v18 = vadd.f32 %v1121_v26, %v1107_v27 }
 0x3cb   : > { %1748 = vtanh.f32 %v1061_v29  ;;  %v1062_v59 = vadd.f32 %v2308_v33, %v1034_v32  ;;  %v1064_v62 = vadd.f32 %v2308_v33, %v1042_v10 }
 0x3cc   : > { %v1123_v35 = vadd.f32 %v1122_v18, %v1108_v45  ;;  %v1087_v4 = vadd.f32 %v2365_v17, %v1086_v21  ;;  %1750 = vtanh.f32 %v1063_v43 }
 0x3cd   : > { %v2382_v36 = vpop.eup %1740  ;;  %1752 = vtanh.f32 %v1062_v59 }
 0x3ce   : > { %v2384_v3 = vpop.eup %1742  ;;  %v1088_v47 = vadd.f32 %v2382_v36, %v1087_v4  ;;  %v1110_v38 = vmul.f32 %v2382_v36, %v2382_v36  ;;  %v1124_v14 = vadd.f32 %v1123_v35, %v1109_v46  ;;  %1754 = vtanh.f32 %v1064_v62 }
 0x3cf   : > { %v2389_v48 = vpop.eup %1744  ;;  %v1112_v7 = vmul.f32 %v2384_v3, %v2384_v3 }
 0x3d0   : > { %v1125_v1 = vadd.f32 %v1124_v14, %v1110_v38  ;;  %v1089_v39 = vadd.f32 %v2389_v48, %v1088_v47  ;;  %v1111_v33 = vmul.f32 %v2389_v48, %v2389_v48  ;;  %v2394_v52 = vpop.eup %1746 }
 0x3d1   : > { %v1113_v23 = vmul.f32 %v2394_v52, %v2394_v52 }
 0x3d2   : > { %v1090_v19 = vadd.f32 %v2384_v3, %v1089_v39  ;;  %v1126_v12 = vadd.f32 %v1125_v1, %v1111_v33 }
 0x3d4   : > { %v1127_v63 = vadd.f32 %v1126_v12, %v1112_v7  ;;  %v1091_v20 = vadd.f32 %v2394_v52, %v1090_v19 }
 0x3d5   : > { %v2402_v16 = vpop.eup %1748 }
 0x3d6   : > { %v1092_v41 = vadd.f32 %v2402_v16, %v1091_v20  ;;  %v1114_v25 = vmul.f32 %v2402_v16, %v2402_v16  ;;  %v1128_v24 = vadd.f32 %v1127_v63, %v1113_v23  ;;  %v2407_v26 = vpop.eup %1750 }
 0x3d7   : > { %v2409_v42 = vpop.eup %1752  ;;  %v1116_v30 = vmul.f32 %v2407_v26, %v2407_v26 }
 0x3d8   : > { %v1129_v27 = vadd.f32 %v1128_v24, %v1114_v25  ;;  %v1093_v11 = vadd.f32 %v2409_v42, %v1092_v41  ;;  %v1115_v43 = vmul.f32 %v2409_v42, %v2409_v42  ;;  %v2414_v29 = vpop.eup %1754 }
 0x3d9   : > { %v1117_v32 = vmul.f32 %v2414_v29, %v2414_v29 }
 0x3da   : > { %v1094_v10 = vadd.f32 %v2407_v26, %v1093_v11  ;;  %v1130_v44 = vadd.f32 %v1129_v27, %v1115_v43 }
 0x3dc   : > { %v1095_v45 = vadd.f32 %v2414_v29, %v1094_v10  ;;  %v1131_v21 = vadd.f32 %v1130_v44, %v1116_v30 }
 0x3de   : > { %v1096_v18 = vrot.slane %v1095_v45, 4  ;;  %v1132_v59 = vadd.f32 %v1131_v21, %v1117_v32 }
 0x3e0   : > { %v1097_v46 = vadd.f32 %v1096_v18, %v1095_v45  ;;  %v1133_v35 = vrot.slane %v1132_v59, 4 }
 0x3e2   : > { %v1098_v4 = vrot.slane %v1097_v46, 2  ;;  %v1134_v62 = vadd.f32 %v1133_v35, %v1132_v59 }
 0x3e4   : > { %v1099_v47 = vadd.f32 %v1098_v4, %v1097_v46  ;;  %v1135_v38 = vrot.slane %v1134_v62, 2 }
 0x3e6   : > { %v1100_v14 = vrot.slane %v1099_v47, 1  ;;  %v1136_v1 = vadd.f32 %v1135_v38, %v1134_v62 }
 0x3e8   : > { %v1101_v39 = vadd.f32 %v1100_v14, %v1099_v47  ;;  %v1137_v33 = vrot.slane %v1136_v1, 1 }
 0x3ea   : > { %v1138_v7 = vadd.f32 %v1137_v33, %v1136_v1  ;;  %v2422_v19 = vmul.f32 0.0078125, %v1101_v39 }
 0x3ec   : > { %v1140_v12 = vmul.f32 0.0078125, %v1138_v7  ;;  %v1141_v23 = vmul.f32 %v2422_v19, %v2422_v19  ;;  %v1146_v63 = vsub.f32 %v2326_v61, %v2422_v19  ;;  %v1147_v20 = vsub.f32 %v2330_v0, %v2422_v19 }
 0x3ed   : > { %v1154_v41 = vsub.f32 %v2382_v36, %v2422_v19  ;;  %v1155_v25 = vsub.f32 %v2389_v48, %v2422_v19  ;;  %v1148_v24 = vsub.f32 %v2328_v13, %v2422_v19  ;;  %v1149_v27 = vsub.f32 %v2333_v58, %v2422_v19 }
 0x3ee   : > { %v1142_v11 = vsub.f32 %v1140_v12, %v1141_v23  ;;  %v1156_v43 = vsub.f32 %v2384_v3, %v2422_v19  ;;  %v1157_v61 = vsub.f32 %v2394_v52, %v2422_v19  ;;  %v1150_v0 = vsub.f32 %v2354_v15, %v2422_v19 }
 0x3ef   : > { %v1151_v36 = vsub.f32 %v2362_v56, %v2422_v19  ;;  %v1158_v48 = vsub.f32 %v2402_v16, %v2422_v19  ;;  %v1159_v13 = vsub.f32 %v2409_v42, %v2422_v19  ;;  %v1152_v58 = vsub.f32 %v2356_v49, %v2422_v19  ;;  %v1758_v49 = vld [vmem:[%s2543_s3] sm:$0xff] }
 0x3f0   : > { %v1143_v30 = vadd.f32 0.8, %v1142_v11  ;;  %v1153_v3 = vsub.f32 %v2365_v17, %v2422_v19  ;;  %v1160_v52 = vsub.f32 %v2407_v26, %v2422_v19  ;;  %v1161_v15 = vsub.f32 %v2414_v29, %v2422_v19 }
 0x3f1   : > { %v1164_v56 = vsub.s32 4, %v2004_v50  ;;  %v1184_v16 = vsub.s32 5, %v2004_v50 }
 0x3f2   : > { %1756 = vrsqrt.f32 %v1143_v30 }
 0x3f3   : > { %v1185_v32 = vrot.slane %v1758_v49, %v1184_v16 }
 0x3fc   : > { %v1757_v10 = vpop.eup %1756 }
 0x3fd   : > { %v1145_v42 = vmul.f32 %v1758_v49, %v1757_v10 }
 0x3ff   : > { %v1165_v44 = vrot.slane %v1145_v42, %v1164_v56 }
 0x401   : > { %v1166_v17 = vmul.f32 %v1165_v44, %v1146_v63  ;;  %v1167_v45 = vmul.f32 %v1165_v44, %v1147_v20  ;;  %v1174_v21 = vmul.f32 %v1165_v44, %v1154_v41  ;;  %v1175_v26 = vmul.f32 %v1165_v44, %v1155_v25 }
 0x402   : > { %v1168_v18 = vmul.f32 %v1165_v44, %v1148_v24  ;;  %v1169_v59 = vmul.f32 %v1165_v44, %v1149_v27  ;;  %v1176_v29 = vmul.f32 %v1165_v44, %v1156_v43  ;;  %v1177_v46 = vmul.f32 %v1165_v44, %v1157_v61 }
 0x403   : > { %v1186_v35 = vadd.f32 %v1185_v32, %v1166_v17  ;;  %v1187_v4 = vadd.f32 %v1185_v32, %v1167_v45  ;;  %v1194_v62 = vadd.f32 %v1185_v32, %v1174_v21  ;;  %v1195_v47 = vadd.f32 %v1185_v32, %v1175_v26 }
 0x404   : > { %v1188_v38 = vadd.f32 %v1185_v32, %v1168_v18  ;;  %v1189_v14 = vadd.f32 %v1185_v32, %v1169_v59  ;;  %v1196_v1 = vadd.f32 %v1185_v32, %v1176_v29  ;;  %v1197_v39 = vadd.f32 %v1185_v32, %v1177_v46 }
 0x405   : > { %v1202_v33 = vpack.c.bf16 %v1187_v4, %v1186_v35  ;;  %v1206_v7 = vpack.c.bf16 %v1195_v47, %v1194_v62  ;;  %v1170_v19 = vmul.f32 %v1165_v44, %v1150_v0  ;;  %v1171_v12 = vmul.f32 %v1165_v44, %v1151_v36 }
 0x406   : > { %v1203_v23 = vpack.c.bf16 %v1189_v14, %v1188_v38  ;;  %v1207_v63 = vpack.c.bf16 %v1197_v39, %v1196_v1  ;;  %v1178_v20 = vmul.f32 %v1165_v44, %v1158_v48  ;;  %v1179_v41 = vmul.f32 %v1165_v44, %v1159_v13 }
 0x407   : > { %1583 = vmatprep.mubr.bf16.mxu0 %v1202_v33  ;;  %1591 = vmatprep.mubr.bf16.mxu1 %v1206_v7  ;;  %v1190_v25 = vadd.f32 %v1185_v32, %v1170_v19  ;;  %v1191_v24 = vadd.f32 %v1185_v32, %v1171_v12  ;;  %v1172_v27 = vmul.f32 %v1165_v44, %v1152_v58  ;;  %v1325_v58 = vsub.s32 7, %v2004_v50 }
 0x408   : > { %1584 = vmatmul.mubr.bf16.vlgmr.msra.gmra.mrb[32].mxu0 %v1203_v23  ;;  %1592 = vmatmul.mubr.bf16.vlgmr.msra.gmra.mrb[32].mxu1 %v1207_v63  ;;  %v1198_v11 = vadd.f32 %v1185_v32, %v1178_v20  ;;  %v1199_v43 = vadd.f32 %v1185_v32, %v1179_v41  ;;  %v1173_v61 = vmul.f32 %v1165_v44, %v1153_v3 }
 0x409   : > { %v1204_v30 = vpack.c.bf16 %v1191_v24, %v1190_v25  ;;  %v1192_v56 = vadd.f32 %v1185_v32, %v1172_v27  ;;  %v1180_v16 = vmul.f32 %v1165_v44, %v1160_v52  ;;  %v1181_v10 = vmul.f32 %v1165_v44, %v1161_v15 }
 0x40a   : > { %v1208_v0 = vpack.c.bf16 %v1199_v43, %v1198_v11  ;;  %v1193_v36 = vadd.f32 %v1185_v32, %v1173_v61  ;;  %v2465_v26 = vrot.slane %v1758_v49, %v1325_v58 }
 0x40b   : > { %1587 = vmatprep.mubr.bf16.mxu0 %v1204_v30  ;;  %v1200_v42 = vadd.f32 %v1185_v32, %v1180_v16  ;;  %v1201_v48 = vadd.f32 %v1185_v32, %v1181_v10 }
 0x40c   : > { %1595 = vmatprep.mubr.bf16.mxu1 %v1208_v0  ;;  %v1205_v13 = vpack.c.bf16 %v1193_v36, %v1192_v56 }
 0x40d   : > { %v1209_v17 = vpack.c.bf16 %v1201_v48, %v1200_v42 }
 0x410   : > { %1588 = vmatmul.mubr.bf16.gmra.mrb[36].mxu0 %v1205_v13  ;;  %1596 = vmatmul.mubr.bf16.gmra.mrb[36].mxu1 %v1209_v17 }
 0x4db   : > { %v1585_v45 = vpop.f32.mrb[32].mxu0  ;;  %v1593_v21 = vpop.f32.mrb[32].mxu1 }
 0x4dc   : > { %v1253_v3 = vadd.f32 %v1585_v45, %v2169_v54  ;;  %v1285_v52 = vadd.f32 %v1593_v21, %v2169_v54  ;;  %v1244_v15 = vpop.f32.mrb[33].mxu0  ;;  %v1276_v44 = vpop.f32.mrb[33].mxu1 }
 0x4dd   : > { %v1245_v18 = vadd.f32 %v1244_v15, %v2169_v54  ;;  %v1277_v32 = vadd.f32 %v1276_v44, %v2169_v54  ;;  %v1586_v59 = vpop.f32.mrb[34].mxu0  ;;  %v1594_v29 = vpop.f32.mrb[34].mxu1 }
 0x4de   : > { %v1309_v46 = vsub.f32 %v2172_v60, %v1253_v3  ;;  %v1317_v50 = vsub.f32 %v2204_v2, %v1285_v52  ;;  %v1256_v35 = vadd.f32 %v1586_v59, %v2169_v54  ;;  %v1288_v49 = vadd.f32 %v1594_v29, %v2169_v54  ;;  %v1247_v4 = vpop.f32.mrb[35].mxu0  ;;  %v1279_v62 = vpop.f32.mrb[35].mxu1 }
 0x4df   : > { %v1307_v47 = vsub.f32 %v2175_v57, %v1245_v18  ;;  %v1315_v38 = vsub.f32 %v2207_v55, %v1277_v32  ;;  %v1248_v14 = vadd.f32 %v1247_v4, %v2169_v54  ;;  %v1280_v1 = vadd.f32 %v1279_v62, %v2169_v54 }
 0x4e0   : > { %v1329_v39 = vmul.f32 %v2465_v26, %v1309_v46  ;;  %v1337_v60 = vmul.f32 %v2465_v26, %v1317_v50  ;;  %v1310_v2 = vsub.f32 %v2179_v34, %v1256_v35  ;;  %v1318_v33 = vsub.f32 %v2212_v28, %v1288_v49 }
 0x4e1   : > { %v1327_v57 = vmul.f32 %v2465_v26, %v1307_v47  ;;  %v1335_v55 = vmul.f32 %v2465_v26, %v1315_v38  ;;  %v1308_v7 = vsub.f32 %v2183_v40, %v1248_v14  ;;  %v1316_v19 = vsub.f32 %v2217_v22, %v1280_v1 }
 0x4e2   : > { %v1345_v12 = vadd.f32 %v1329_v39, %v1253_v3  ;;  %v1353_v34 = vadd.f32 %v1337_v60, %v1285_v52  ;;  %v1330_v28 = vmul.f32 %v2465_v26, %v1310_v2  ;;  %v1338_v23 = vmul.f32 %v2465_v26, %v1318_v33 }
 0x4e3   : > { %v1343_v63 = vadd.f32 %v1327_v57, %v1245_v18  ;;  %v1351_v20 = vadd.f32 %v1335_v55, %v1277_v32  ;;  %v1328_v41 = vmul.f32 %v2465_v26, %v1308_v7  ;;  %v1336_v25 = vmul.f32 %v2465_v26, %v1316_v19  ;;  %v1589_v24 = vpop.f32.mrb[36].mxu0  ;;  %v1597_v27 = vpop.f32.mrb[36].mxu1 }
 0x4e4   : > { %1361 = vst [vmem:[%s2487_s5 + $0x10] sm:$0xff] %v1345_v12  ;;  %1369 = vst [vmem:[%s2487_s5 + $0x50] sm:$0xff] %v1353_v34  ;;  %v1346_v40 = vadd.f32 %v1330_v28, %v1256_v35  ;;  %v1354_v22 = vadd.f32 %v1338_v23, %v1288_v49  ;;  %v1269_v11 = vadd.f32 %v1589_v24, %v2169_v54  ;;  %v1260_v61 = vpop.f32.mrb[37].mxu0  ;;  %v1292_v30 = vpop.f32.mrb[37].mxu1 }
 0x4e5   : > { %v1301_v43 = vadd.f32 %v1597_v27, %v2169_v54  ;;  %1359 = vst [vmem:[%s2487_s5] sm:$0xff] %v1343_v63  ;;  %1367 = vst [vmem:[%s2487_s5 + $0x40] sm:$0xff] %v1351_v20  ;;  %v1344_v56 = vadd.f32 %v1328_v41, %v1248_v14  ;;  %v1352_v16 = vadd.f32 %v1336_v25, %v1280_v1  ;;  %v1590_v36 = vpop.f32.mrb[38].mxu0  ;;  %v1598_v42 = vpop.f32.mrb[38].mxu1 }
 0x4e6   : > { %v1261_v10 = vadd.f32 %v1260_v61, %v2169_v54  ;;  %v1293_v0 = vadd.f32 %v1292_v30, %v2169_v54  ;;  %1362 = vst [vmem:[%s2487_s5 + $0x18] sm:$0xff] %v1346_v40  ;;  %1370 = vst [vmem:[%s2487_s5 + $0x58] sm:$0xff] %v1354_v22  ;;  %v1313_v48 = vsub.f32 %v2188_v8, %v1269_v11  ;;  %v1263_v45 = vpop.f32.mrb[39].mxu0  ;;  %v1295_v21 = vpop.f32.mrb[39].mxu1 }
 0x4e7   : > { %v1321_v13 = vsub.f32 %v2227_v51, %v1301_v43  ;;  %v1272_v17 = vadd.f32 %v1590_v36, %v2169_v54  ;;  %v1304_v58 = vadd.f32 %v1598_v42, %v2169_v54  ;;  %1360 = vst [vmem:[%s2487_s5 + $0x8] sm:$0xff] %v1344_v56  ;;  %1368 = vst [vmem:[%s2487_s5 + $0x48] sm:$0xff] %v1352_v16 }
 0x4e8   : > { %v1311_v3 = vsub.f32 %v2191_v6, %v1261_v10  ;;  %v1319_v52 = vsub.f32 %v2231_v53, %v1293_v0  ;;  %v1264_v15 = vadd.f32 %v1263_v45, %v2169_v54  ;;  %v1296_v44 = vadd.f32 %v1295_v21, %v2169_v54 }
 0x4e9   : > { %v1333_v8 = vmul.f32 %v2465_v26, %v1313_v48  ;;  %v1341_v51 = vmul.f32 %v2465_v26, %v1321_v13  ;;  %v1314_v18 = vsub.f32 %v2195_v37, %v1272_v17  ;;  %v1322_v32 = vsub.f32 %v2235_v9, %v1304_v58 }
 0x4ea   : > { %v1331_v59 = vmul.f32 %v2465_v26, %v1311_v3  ;;  %v1339_v6 = vmul.f32 %v2465_v26, %v1319_v52  ;;  %v1312_v53 = vsub.f32 %v2199_v31, %v1264_v15  ;;  %v1320_v54 = vsub.f32 %v2240_v5, %v1296_v44 }
 0x4eb   : > { %v1349_v29 = vadd.f32 %v1333_v8, %v1269_v11  ;;  %v1357_v46 = vadd.f32 %v1341_v51, %v1301_v43  ;;  %v1334_v50 = vmul.f32 %v2465_v26, %v1314_v18  ;;  %v1342_v37 = vmul.f32 %v2465_v26, %v1322_v32 }
 0x4ec   : > { %v1347_v9 = vadd.f32 %v1331_v59, %v1261_v10  ;;  %v1355_v35 = vadd.f32 %v1339_v6, %v1293_v0  ;;  %v1332_v49 = vmul.f32 %v2465_v26, %v1312_v53  ;;  %v1340_v4 = vmul.f32 %v2465_v26, %v1320_v54 }
 0x4ed   : > { %1365 = vst [vmem:[%s2487_s5 + $0x30] sm:$0xff] %v1349_v29  ;;  %1373 = vst [vmem:[%s2487_s5 + $0x70] sm:$0xff] %v1357_v46  ;;  %v1350_v31 = vadd.f32 %v1334_v50, %v1272_v17  ;;  %v1358_v5 = vadd.f32 %v1342_v37, %v1304_v58 }
 0x4ee   : > { %1363 = vst [vmem:[%s2487_s5 + $0x20] sm:$0xff] %v1347_v9  ;;  %1371 = vst [vmem:[%s2487_s5 + $0x60] sm:$0xff] %v1355_v35  ;;  %v1348_v62 = vadd.f32 %v1332_v49, %v1264_v15  ;;  %v1356_v47 = vadd.f32 %v1340_v4, %v1296_v44 }
 0x4ef   : > { %1366 = vst [vmem:[%s2487_s5 + $0x38] sm:$0xff] %v1350_v31  ;;  %1374 = vst [vmem:[%s2487_s5 + $0x78] sm:$0xff] %v1358_v5 }
 0x4f0   : > { %1364 = vst [vmem:[%s2487_s5 + $0x28] sm:$0xff] %v1348_v62  ;;  %1372 = vst [vmem:[%s2487_s5 + $0x68] sm:$0xff] %v1356_v47 }
 0x4f1 PF: > { %s14_s15 = sadd.s32 1, %s1765_s15  }
 0x4f2   : > { %p11_p4 = scmp.ge.s32.totalorder %s14_s15, 6  }
 0x4f4   :  { %13 = sbr.rel (!%p11_p4) target bundleno = 1 (0x1), region = 66 }

</bundles_post_ra>
